<compile_context>
chip_gen: v7x
topology: tpu7x:2x2x1
jax: 0.10.0
libtpu: 0.0.40
codegen_flags: <defaults>
</compile_context>

<pallas_src>
import functools

import jax
import jax.numpy as jnp
from jax.experimental import pallas as pl
from jax.experimental.pallas import tpu as pltpu


def _round_up(n, m):
    return ((n + m - 1) // m) * m


def _lstm_decoder_kernel(x_ref, wih_ref, whh_ref, b_ref, wout_ref, bout_ref,
                         out_ref, h_all):
    """Single-invocation kernel: whole (tiny) problem lives in VMEM.

    x_ref    : (B, E)        input embedding (same vector fed at every step)
    wih_ref  : (E, 4*Hp)     LSTM input weights, transposed, gate-reordered,
                             per-gate padded (matmul dtype: f32 or bf16)
    whh_ref  : (Hp, 4*Hp)    LSTM recurrent weights, transposed, padded
    b_ref    : (1, 4*Hp)     fused LSTM bias (b_ih + b_hh), f32, padded
    wout_ref : (Hp, Fp)      output Linear weight, transposed, padded
    bout_ref : (1, Fp)       output Linear bias, f32, padded
    out_ref  : (B, S, Fp)    batch-first padded output
    h_all    : (B, S, Hp)    VMEM scratch holding all hidden states
    """
    B, S, Hp = h_all.shape
    Fp = out_ref.shape[2]
    mm_dtype = whh_ref.dtype   # f32 (exact) or bf16 (fast path)

    # The input projection is identical for every timestep (the PyTorch code
    # repeats the same embedding S times), so compute it once, bias fused.
    x_proj = jnp.dot(x_ref[...].astype(mm_dtype), wih_ref[...],
                     preferred_element_type=jnp.float32) + b_ref[...]  # (B,4Hp)

    h = jnp.zeros((B, Hp), jnp.float32)
    c = jnp.zeros((B, Hp), jnp.float32)

    # Fully unrolled recurrence (S is a small compile-time constant).  The
    # recurrent weight is read inside the dot each step: at 256 KiB it cannot
    # be kept resident in the 64-vreg (256 KiB) register file, so there is no
    # pre-loop hoist (perf-review fix).  Only the recurrent matmul and the
    # gate nonlinearities sit on the serial chain; output projection and the
    # output store are hoisted out of the loop.
    # TODO(synk): drive the MXU explicitly (matmul_push_rhs once, acc/pop per
    # step) to stop re-streaming the 128x512 weight every step.
    for t in range(S):
        gates = x_proj + jnp.dot(h.astype(mm_dtype), whh_ref[...],
                                 preferred_element_type=jnp.float32)  # (B,4Hp)
        # Gate layout is [i, f, o, g] (reordered in prepare_*), so the three
        # sigmoid gates are a single lane-contiguous EUP call.
        # Padded lanes stay exactly 0: sigmoid(0)=0.5 on i/f/o, tanh(0)=0 on
        # g, c0=0  =>  c_pad = 0.5*0 + 0.5*0 = 0, h_pad = 0.5*tanh(0) = 0.
        sig = jax.nn.sigmoid(gates[:, :3 * Hp])
        i_g = sig[:, 0 * Hp:1 * Hp]
        f_g = sig[:, 1 * Hp:2 * Hp]
        o_g = sig[:, 2 * Hp:3 * Hp]
        g_g = jnp.tanh(gates[:, 3 * Hp:])

        c = f_g * c + i_g * g_g
        h = o_g * jnp.tanh(c)

        # Lane-dense (B, Hp) store at a static index (batch-first layout).
        h_all[:, t, :] = h

    # ReLU -> (Dropout == identity at inference) -> output Linear, batched
    # over all B*S rows in a single MXU call, then one lane-dense store.
    y = jnp.maximum(h_all[...], 0.0).reshape(B * S, Hp)
    y = jnp.dot(y.astype(mm_dtype), wout_ref[...],
                preferred_element_type=jnp.float32) + bout_ref[...]   # (B*S,Fp)
    out_ref[...] = y.reshape(B, S, Fp).astype(out_ref.dtype)


def prepare_lstm_decoder_params(params, matmul_dtype=jnp.float32):
    """ONE-TIME weight preparation (call once, reuse for every forward call).

    Transposes the PyTorch-layout weights, reorders the LSTM gate blocks from
    [i, f, g, o] to [i, f, o, g], zero-pads every gate / output block to a
    128-lane boundary and fuses the two LSTM biases.  Doing this per forward
    call would cost more than the kernel itself at these sizes.

    matmul_dtype: jnp.float32 for bit-exact nn.LSTM/nn.Linear float32
    semantics, or jnp.bfloat16 to cut MXU passes ~3x (gate math, c/h state
    and accumulation stay f32 -- mandatory on v5e).
    """
    w_ih, w_hh, b_ih, b_hh = (params["w_ih"], params["w_hh"],
                              params["b_ih"], params["b_hh"])
    w_out, b_out = params["w_out"], params["b_out"]
    H = w_hh.shape[1]          # hidden_dim = 2 * embedding_dim
    F = w_out.shape[0]         # n_features
    Hp = _round_up(H, 128)     # lane-aligned (padded) hidden dim
    Fp = _round_up(F, 128)     # lane-aligned (padded) output dim
    perm = jnp.array([0, 1, 3, 2])   # [i, f, g, o] -> [i, f, o, g]

    def prep_gate_cols(w_t):
        # (K, 4H) -> (K, 4Hp): reorder gate blocks, zero-pad each to Hp cols.
        K = w_t.shape[0]
        w4 = w_t.reshape(K, 4, H)[:, perm, :]
        w4 = jnp.pad(w4, ((0, 0), (0, 0), (0, Hp - H)))
        return w4.reshape(K, 4 * Hp)

    wih_p = prep_gate_cols(jnp.transpose(w_ih)).astype(matmul_dtype)   # (E,4Hp)
    whh_p = jnp.pad(prep_gate_cols(jnp.transpose(w_hh)),
                    ((0, Hp - H), (0, 0))).astype(matmul_dtype)        # (Hp,4Hp)
    bias_p = jnp.pad((b_ih + b_hh).reshape(4, H)[perm],
                     ((0, 0), (0, Hp - H))).reshape(1, 4 * Hp)         # (1,4Hp)
    wout_p = jnp.pad(jnp.transpose(w_out),
                     ((0, Hp - H), (0, Fp - F))).astype(matmul_dtype)  # (Hp,Fp)
    bout_p = jnp.pad(b_out.reshape(1, F), ((0, 0), (0, Fp - F)))       # (1,Fp)

    return {"wih": wih_p, "whh": whh_p, "bias": bias_p,
            "wout": wout_p, "bout": bout_p,
            "H": H, "F": F, "Hp": Hp, "Fp": Fp}


def lstm_decoder_forward(x, seq_len, prepped):
    """x: (B, E) float32. Returns (B, seq_len, n_features) float32."""
    B = x.shape[0]
    Hp, Fp, F = prepped["Hp"], prepped["Fp"], prepped["F"]

    vmem = pl.BlockSpec(memory_space=pltpu.MemorySpace.VMEM)

    # TODO(synk): at non-toy batch sizes add a grid over B (parallel) so both
    # v7x TensorCores are used; size the B-tile for v7x's 64 MiB VMEM.
    out_padded = pl.pallas_call(
        _lstm_decoder_kernel,
        out_shape=jax.ShapeDtypeStruct((B, seq_len, Fp), jnp.float32),
        in_specs=[vmem] * 6,
        out_specs=vmem,
        scratch_shapes=[
            pltpu.VMEM((B, seq_len, Hp), jnp.float32),   # all hidden states
        ],
    )(x, prepped["wih"], prepped["whh"], prepped["bias"],
      prepped["wout"], prepped["bout"])

    # Already batch-first; just drop the lane padding.
    # TODO(synk): once B*S is large, emit (B, S, F) with a masked store (or
    # pack S*F into lanes) instead of padding F -> 128 and slicing here.
    return out_padded[:, :, :F]


def _reference_forward(x, seq_len, params):
    """Pure-JAX reference of the same forward pass (for a sanity check)."""
    w_ih, w_hh, b_ih, b_hh = (params["w_ih"], params["w_hh"],
                              params["b_ih"], params["b_hh"])
    w_out, b_out = params["w_out"], params["b_out"]
    H = w_hh.shape[1]
    B = x.shape[0]
    h = jnp.zeros((B, H), jnp.float32)
    c = jnp.zeros((B, H), jnp.float32)
    x_proj = x @ w_ih.T + b_ih + b_hh
    ys = []
    for _ in range(seq_len):
        gates = x_proj + h @ w_hh.T
        i_g = jax.nn.sigmoid(gates[:, 0 * H:1 * H])
        f_g = jax.nn.sigmoid(gates[:, 1 * H:2 * H])
        g_g = jnp.tanh(gates[:, 2 * H:3 * H])
        o_g = jax.nn.sigmoid(gates[:, 3 * H:4 * H])
        c = f_g * c + i_g * g_g
        h = o_g * jnp.tanh(c)
        ys.append(jnp.maximum(h, 0.0) @ w_out.T + b_out)
    return jnp.stack(ys, axis=1)


def init_params(key, embedding_dim, n_features):
    """Deterministic init, mirroring nn.LSTM / nn.Linear default U(-k, k)."""
    H = 2 * embedding_dim
    k_lstm = 1.0 / jnp.sqrt(jnp.float32(H))
    k_lin = 1.0 / jnp.sqrt(jnp.float32(H))
    ks = jax.random.split(key, 6)
    u = lambda k, shape, b: jax.random.uniform(k, shape, jnp.float32, -b, b)
    return {
        "w_ih": u(ks[0], (4 * H, embedding_dim), k_lstm),   # gate order i,f,g,o
        "w_hh": u(ks[1], (4 * H, H), k_lstm),
        "b_ih": u(ks[2], (4 * H,), k_lstm),
        "b_hh": u(ks[3], (4 * H,), k_lstm),
        "w_out": u(ks[4], (n_features, H), k_lin),
        "b_out": u(ks[5], (n_features,), k_lin),
    }


if __name__ == "__main__":
    embedding_dim = 32      # -> hidden_dim = 64 (padded to 128 in-kernel)
    n_features = 4
    batch = 2
    seq_len = 8

    key = jax.random.PRNGKey(0)
    pkey, xkey = jax.random.split(key)
    params = init_params(pkey, embedding_dim, n_features)
    x = jax.random.normal(xkey, (batch, embedding_dim), jnp.float32)

    ref = _reference_forward(x, seq_len, params)

    # Exact path: f32 matmul operands (bit-matches nn.LSTM / nn.Linear f32).
    prepped_f32 = prepare_lstm_decoder_params(params, jnp.float32)
    fwd_f32 = jax.jit(functools.partial(lstm_decoder_forward,
                                        seq_len=seq_len, prepped=prepped_f32))
    out = fwd_f32(x)
    jax.block_until_ready(out)
    assert out.shape == (batch, seq_len, n_features), out.shape
    assert jnp.allclose(out, ref, atol=1e-5, rtol=1e-5), "f32 mismatch vs ref"

    # Fast path: bf16 matmul operands (~3x fewer MXU passes), f32 gate math.
    prepped_bf16 = prepare_lstm_decoder_params(params, jnp.bfloat16)
    fwd_bf16 = jax.jit(functools.partial(lstm_decoder_forward,
                                         seq_len=seq_len, prepped=prepped_bf16))
    out_bf16 = fwd_bf16(x)
    jax.block_until_ready(out_bf16)
    assert jnp.allclose(out_bf16, ref, atol=1e-1, rtol=1e-1), "bf16 path off"

    print("KERNEL_OK")
</pallas_src>

<mosaic_0001>
module attributes {stable_mosaic.version = 11 : i64} {
  func.func @_lstm_decoder_kernel(%arg0: memref<2x32xf32, #tpu.memory_space<vmem>>, %arg1: memref<32x512xf32, #tpu.memory_space<vmem>>, %arg2: memref<128x512xf32, #tpu.memory_space<vmem>>, %arg3: memref<1x512xf32, #tpu.memory_space<vmem>>, %arg4: memref<128x128xf32, #tpu.memory_space<vmem>>, %arg5: memref<1x128xf32, #tpu.memory_space<vmem>>, %arg6: memref<2x8x128xf32, #tpu.memory_space<vmem>>, %arg7: memref<2x8x128xf32, #tpu.memory_space<vmem>>) attributes {dimension_semantics = [], scalar_prefetch = 0 : i64, scratch_operands = 1 : i64, tpu.core_type = #tpu.core_type<tc>} {
    %c0 = arith.constant 0 : index
    %c0_0 = arith.constant 0 : index
    %0 = vector.load %arg0[%c0, %c0_0] : memref<2x32xf32, #tpu.memory_space<vmem>>, vector<2x32xf32>
    %c0_1 = arith.constant 0 : index
    %c0_2 = arith.constant 0 : index
    %1 = vector.load %arg1[%c0_1, %c0_2] : memref<32x512xf32, #tpu.memory_space<vmem>>, vector<32x512xf32>
    %cst = arith.constant dense<0.000000e+00> : vector<2x512xf32>
    %2 = tpu.matmul %0, %1, %cst {dimension_numbers = #tpu.dot_dimension_numbers<[1], [0], [0], [1], [0, 0, 1, 1], [], []>} : vector<2x32xf32>, vector<32x512xf32>, vector<2x512xf32> -> vector<2x512xf32>
    %c0_3 = arith.constant 0 : index
    %c0_4 = arith.constant 0 : index
    %3 = vector.load %arg3[%c0_3, %c0_4] : memref<1x512xf32, #tpu.memory_space<vmem>>, vector<1x512xf32>
    %4 = vector.broadcast %3 : vector<1x512xf32> to vector<2x512xf32>
    %5 = arith.addf %2, %4 : vector<2x512xf32>
    %cst_5 = arith.constant 0.000000e+00 : f32
    %6 = vector.broadcast %cst_5 : f32 to vector<2x128xf32>
    %cst_6 = arith.constant 0.000000e+00 : f32
    %7 = vector.broadcast %cst_6 : f32 to vector<2x128xf32>
    %c0_7 = arith.constant 0 : index
    %c0_8 = arith.constant 0 : index
    %8 = vector.load %arg2[%c0_7, %c0_8] : memref<128x512xf32, #tpu.memory_space<vmem>>, vector<128x512xf32>
    %cst_9 = arith.constant dense<0.000000e+00> : vector<2x512xf32>
    %9 = tpu.matmul %6, %8, %cst_9 {dimension_numbers = #tpu.dot_dimension_numbers<[1], [0], [0], [1], [0, 0, 1, 1], [], []>} : vector<2x128xf32>, vector<128x512xf32>, vector<2x512xf32> -> vector<2x512xf32>
    %10 = arith.addf %5, %9 : vector<2x512xf32>
    %11 = vector.extract_strided_slice %10 {offsets = [0, 0], sizes = [2, 384], strides = [1, 1]} : vector<2x512xf32> to vector<2x384xf32>
    %12 = arith.negf %11 : vector<2x384xf32>
    %13 = math.exp %12 : vector<2x384xf32>
    %cst_10 = arith.constant 1.000000e+00 : f32
    %14 = vector.broadcast %cst_10 : f32 to vector<2x384xf32>
    %15 = arith.addf %14, %13 : vector<2x384xf32>
    %16 = arith.divf %14, %15 : vector<2x384xf32>
    %17 = vector.extract_strided_slice %16 {offsets = [0, 0], sizes = [2, 128], strides = [1, 1]} : vector<2x384xf32> to vector<2x128xf32>
    %18 = vector.extract_strided_slice %16 {offsets = [0, 128], sizes = [2, 128], strides = [1, 1]} : vector<2x384xf32> to vector<2x128xf32>
    %19 = vector.extract_strided_slice %16 {offsets = [0, 256], sizes = [2, 128], strides = [1, 1]} : vector<2x384xf32> to vector<2x128xf32>
    %20 = vector.extract_strided_slice %10 {offsets = [0, 384], sizes = [2, 128], strides = [1, 1]} : vector<2x512xf32> to vector<2x128xf32>
    %21 = math.tanh %20 : vector<2x128xf32>
    %22 = arith.mulf %18, %7 : vector<2x128xf32>
    %23 = arith.mulf %17, %21 : vector<2x128xf32>
    %24 = arith.addf %22, %23 : vector<2x128xf32>
    %25 = math.tanh %24 : vector<2x128xf32>
    %26 = arith.mulf %19, %25 : vector<2x128xf32>
    %c0_11 = arith.constant 0 : index
    %c0_12 = arith.constant 0 : index
    %c0_13 = arith.constant 0 : index
    %27 = vector.load %arg7[%c0_11, %c0_12, %c0_13] : memref<2x8x128xf32, #tpu.memory_space<vmem>>, vector<2x1x128xf32>
    %28 = vector.shape_cast %27 : vector<2x1x128xf32> to vector<2x128xf32>
    %29 = vector.shape_cast %26 : vector<2x128xf32> to vector<2x1x128xf32>
    tpu.vector_store %arg7[%c0_11, %c0_12, %c0_13], %29 {strides = array<i32>} : memref<2x8x128xf32, #tpu.memory_space<vmem>>, vector<2x1x128xf32>,
    %c0_14 = arith.constant 0 : index
    %c0_15 = arith.constant 0 : index
    %30 = vector.load %arg2[%c0_14, %c0_15] : memref<128x512xf32, #tpu.memory_space<vmem>>, vector<128x512xf32>
    %cst_16 = arith.constant dense<0.000000e+00> : vector<2x512xf32>
    %31 = tpu.matmul %26, %30, %cst_16 {dimension_numbers = #tpu.dot_dimension_numbers<[1], [0], [0], [1], [0, 0, 1, 1], [], []>} : vector<2x128xf32>, vector<128x512xf32>, vector<2x512xf32> -> vector<2x512xf32>
    %32 = arith.addf %5, %31 : vector<2x512xf32>
    %33 = vector.extract_strided_slice %32 {offsets = [0, 0], sizes = [2, 384], strides = [1, 1]} : vector<2x512xf32> to vector<2x384xf32>
    %34 = arith.negf %33 : vector<2x384xf32>
    %35 = math.exp %34 : vector<2x384xf32>
    %cst_17 = arith.constant 1.000000e+00 : f32
    %36 = vector.broadcast %cst_17 : f32 to vector<2x384xf32>
    %37 = arith.addf %36, %35 : vector<2x384xf32>
    %38 = arith.divf %36, %37 : vector<2x384xf32>
    %39 = vector.extract_strided_slice %38 {offsets = [0, 0], sizes = [2, 128], strides = [1, 1]} : vector<2x384xf32> to vector<2x128xf32>
    %40 = vector.extract_strided_slice %38 {offsets = [0, 128], sizes = [2, 128], strides = [1, 1]} : vector<2x384xf32> to vector<2x128xf32>
    %41 = vector.extract_strided_slice %38 {offsets = [0, 256], sizes = [2, 128], strides = [1, 1]} : vector<2x384xf32> to vector<2x128xf32>
    %42 = vector.extract_strided_slice %32 {offsets = [0, 384], sizes = [2, 128], strides = [1, 1]} : vector<2x512xf32> to vector<2x128xf32>
    %43 = math.tanh %42 : vector<2x128xf32>
    %44 = arith.mulf %40, %24 : vector<2x128xf32>
    %45 = arith.mulf %39, %43 : vector<2x128xf32>
    %46 = arith.addf %44, %45 : vector<2x128xf32>
    %47 = math.tanh %46 : vector<2x128xf32>
    %48 = arith.mulf %41, %47 : vector<2x128xf32>
    %c0_18 = arith.constant 0 : index
    %c1 = arith.constant 1 : index
    %c0_19 = arith.constant 0 : index
    %49 = vector.load %arg7[%c0_18, %c1, %c0_19] : memref<2x8x128xf32, #tpu.memory_space<vmem>>, vector<2x1x128xf32>
    %50 = vector.shape_cast %49 : vector<2x1x128xf32> to vector<2x128xf32>
    %51 = vector.shape_cast %48 : vector<2x128xf32> to vector<2x1x128xf32>
    tpu.vector_store %arg7[%c0_18, %c1, %c0_19], %51 {strides = array<i32>} : memref<2x8x128xf32, #tpu.memory_space<vmem>>, vector<2x1x128xf32>,
    %c0_20 = arith.constant 0 : index
    %c0_21 = arith.constant 0 : index
    %52 = vector.load %arg2[%c0_20, %c0_21] : memref<128x512xf32, #tpu.memory_space<vmem>>, vector<128x512xf32>
    %cst_22 = arith.constant dense<0.000000e+00> : vector<2x512xf32>
    %53 = tpu.matmul %48, %52, %cst_22 {dimension_numbers = #tpu.dot_dimension_numbers<[1], [0], [0], [1], [0, 0, 1, 1], [], []>} : vector<2x128xf32>, vector<128x512xf32>, vector<2x512xf32> -> vector<2x512xf32>
    %54 = arith.addf %5, %53 : vector<2x512xf32>
    %55 = vector.extract_strided_slice %54 {offsets = [0, 0], sizes = [2, 384], strides = [1, 1]} : vector<2x512xf32> to vector<2x384xf32>
    %56 = arith.negf %55 : vector<2x384xf32>
    %57 = math.exp %56 : vector<2x384xf32>
    %cst_23 = arith.constant 1.000000e+00 : f32
    %58 = vector.broadcast %cst_23 : f32 to vector<2x384xf32>
    %59 = arith.addf %58, %57 : vector<2x384xf32>
    %60 = arith.divf %58, %59 : vector<2x384xf32>
    %61 = vector.extract_strided_slice %60 {offsets = [0, 0], sizes = [2, 128], strides = [1, 1]} : vector<2x384xf32> to vector<2x128xf32>
    %62 = vector.extract_strided_slice %60 {offsets = [0, 128], sizes = [2, 128], strides = [1, 1]} : vector<2x384xf32> to vector<2x128xf32>
    %63 = vector.extract_strided_slice %60 {offsets = [0, 256], sizes = [2, 128], strides = [1, 1]} : vector<2x384xf32> to vector<2x128xf32>
    %64 = vector.extract_strided_slice %54 {offsets = [0, 384], sizes = [2, 128], strides = [1, 1]} : vector<2x512xf32> to vector<2x128xf32>
    %65 = math.tanh %64 : vector<2x128xf32>
    %66 = arith.mulf %62, %46 : vector<2x128xf32>
    %67 = arith.mulf %61, %65 : vector<2x128xf32>
    %68 = arith.addf %66, %67 : vector<2x128xf32>
    %69 = math.tanh %68 : vector<2x128xf32>
    %70 = arith.mulf %63, %69 : vector<2x128xf32>
    %c0_24 = arith.constant 0 : index
    %c2 = arith.constant 2 : index
    %c0_25 = arith.constant 0 : index
    %71 = vector.load %arg7[%c0_24, %c2, %c0_25] : memref<2x8x128xf32, #tpu.memory_space<vmem>>, vector<2x1x128xf32>
    %72 = vector.shape_cast %71 : vector<2x1x128xf32> to vector<2x128xf32>
    %73 = vector.shape_cast %70 : vector<2x128xf32> to vector<2x1x128xf32>
    tpu.vector_store %arg7[%c0_24, %c2, %c0_25], %73 {strides = array<i32>} : memref<2x8x128xf32, #tpu.memory_space<vmem>>, vector<2x1x128xf32>,
    %c0_26 = arith.constant 0 : index
    %c0_27 = arith.constant 0 : index
    %74 = vector.load %arg2[%c0_26, %c0_27] : memref<128x512xf32, #tpu.memory_space<vmem>>, vector<128x512xf32>
    %cst_28 = arith.constant dense<0.000000e+00> : vector<2x512xf32>
    %75 = tpu.matmul %70, %74, %cst_28 {dimension_numbers = #tpu.dot_dimension_numbers<[1], [0], [0], [1], [0, 0, 1, 1], [], []>} : vector<2x128xf32>, vector<128x512xf32>, vector<2x512xf32> -> vector<2x512xf32>
    %76 = arith.addf %5, %75 : vector<2x512xf32>
    %77 = vector.extract_strided_slice %76 {offsets = [0, 0], sizes = [2, 384], strides = [1, 1]} : vector<2x512xf32> to vector<2x384xf32>
    %78 = arith.negf %77 : vector<2x384xf32>
    %79 = math.exp %78 : vector<2x384xf32>
    %cst_29 = arith.constant 1.000000e+00 : f32
    %80 = vector.broadcast %cst_29 : f32 to vector<2x384xf32>
    %81 = arith.addf %80, %79 : vector<2x384xf32>
    %82 = arith.divf %80, %81 : vector<2x384xf32>
    %83 = vector.extract_strided_slice %82 {offsets = [0, 0], sizes = [2, 128], strides = [1, 1]} : vector<2x384xf32> to vector<2x128xf32>
    %84 = vector.extract_strided_slice %82 {offsets = [0, 128], sizes = [2, 128], strides = [1, 1]} : vector<2x384xf32> to vector<2x128xf32>
    %85 = vector.extract_strided_slice %82 {offsets = [0, 256], sizes = [2, 128], strides = [1, 1]} : vector<2x384xf32> to vector<2x128xf32>
    %86 = vector.extract_strided_slice %76 {offsets = [0, 384], sizes = [2, 128], strides = [1, 1]} : vector<2x512xf32> to vector<2x128xf32>
    %87 = math.tanh %86 : vector<2x128xf32>
    %88 = arith.mulf %84, %68 : vector<2x128xf32>
    %89 = arith.mulf %83, %87 : vector<2x128xf32>
    %90 = arith.addf %88, %89 : vector<2x128xf32>
    %91 = math.tanh %90 : vector<2x128xf32>
    %92 = arith.mulf %85, %91 : vector<2x128xf32>
    %c0_30 = arith.constant 0 : index
    %c3 = arith.constant 3 : index
    %c0_31 = arith.constant 0 : index
    %93 = vector.load %arg7[%c0_30, %c3, %c0_31] : memref<2x8x128xf32, #tpu.memory_space<vmem>>, vector<2x1x128xf32>
    %94 = vector.shape_cast %93 : vector<2x1x128xf32> to vector<2x128xf32>
    %95 = vector.shape_cast %92 : vector<2x128xf32> to vector<2x1x128xf32>
    tpu.vector_store %arg7[%c0_30, %c3, %c0_31], %95 {strides = array<i32>} : memref<2x8x128xf32, #tpu.memory_space<vmem>>, vector<2x1x128xf32>,
    %c0_32 = arith.constant 0 : index
    %c0_33 = arith.constant 0 : index
    %96 = vector.load %arg2[%c0_32, %c0_33] : memref<128x512xf32, #tpu.memory_space<vmem>>, vector<128x512xf32>
    %cst_34 = arith.constant dense<0.000000e+00> : vector<2x512xf32>
    %97 = tpu.matmul %92, %96, %cst_34 {dimension_numbers = #tpu.dot_dimension_numbers<[1], [0], [0], [1], [0, 0, 1, 1], [], []>} : vector<2x128xf32>, vector<128x512xf32>, vector<2x512xf32> -> vector<2x512xf32>
    %98 = arith.addf %5, %97 : vector<2x512xf32>
    %99 = vector.extract_strided_slice %98 {offsets = [0, 0], sizes = [2, 384], strides = [1, 1]} : vector<2x512xf32> to vector<2x384xf32>
    %100 = arith.negf %99 : vector<2x384xf32>
    %101 = math.exp %100 : vector<2x384xf32>
    %cst_35 = arith.constant 1.000000e+00 : f32
    %102 = vector.broadcast %cst_35 : f32 to vector<2x384xf32>
    %103 = arith.addf %102, %101 : vector<2x384xf32>
    %104 = arith.divf %102, %103 : vector<2x384xf32>
    %105 = vector.extract_strided_slice %104 {offsets = [0, 0], sizes = [2, 128], strides = [1, 1]} : vector<2x384xf32> to vector<2x128xf32>
    %106 = vector.extract_strided_slice %104 {offsets = [0, 128], sizes = [2, 128], strides = [1, 1]} : vector<2x384xf32> to vector<2x128xf32>
    %107 = vector.extract_strided_slice %104 {offsets = [0, 256], sizes = [2, 128], strides = [1, 1]} : vector<2x384xf32> to vector<2x128xf32>
    %108 = vector.extract_strided_slice %98 {offsets = [0, 384], sizes = [2, 128], strides = [1, 1]} : vector<2x512xf32> to vector<2x128xf32>
    %109 = math.tanh %108 : vector<2x128xf32>
    %110 = arith.mulf %106, %90 : vector<2x128xf32>
    %111 = arith.mulf %105, %109 : vector<2x128xf32>
    %112 = arith.addf %110, %111 : vector<2x128xf32>
    %113 = math.tanh %112 : vector<2x128xf32>
    %114 = arith.mulf %107, %113 : vector<2x128xf32>
    %c0_36 = arith.constant 0 : index
    %c4 = arith.constant 4 : index
    %c0_37 = arith.constant 0 : index
    %115 = vector.load %arg7[%c0_36, %c4, %c0_37] : memref<2x8x128xf32, #tpu.memory_space<vmem>>, vector<2x1x128xf32>
    %116 = vector.shape_cast %115 : vector<2x1x128xf32> to vector<2x128xf32>
    %117 = vector.shape_cast %114 : vector<2x128xf32> to vector<2x1x128xf32>
    tpu.vector_store %arg7[%c0_36, %c4, %c0_37], %117 {strides = array<i32>} : memref<2x8x128xf32, #tpu.memory_space<vmem>>, vector<2x1x128xf32>,
    %c0_38 = arith.constant 0 : index
    %c0_39 = arith.constant 0 : index
    %118 = vector.load %arg2[%c0_38, %c0_39] : memref<128x512xf32, #tpu.memory_space<vmem>>, vector<128x512xf32>
    %cst_40 = arith.constant dense<0.000000e+00> : vector<2x512xf32>
    %119 = tpu.matmul %114, %118, %cst_40 {dimension_numbers = #tpu.dot_dimension_numbers<[1], [0], [0], [1], [0, 0, 1, 1], [], []>} : vector<2x128xf32>, vector<128x512xf32>, vector<2x512xf32> -> vector<2x512xf32>
    %120 = arith.addf %5, %119 : vector<2x512xf32>
    %121 = vector.extract_strided_slice %120 {offsets = [0, 0], sizes = [2, 384], strides = [1, 1]} : vector<2x512xf32> to vector<2x384xf32>
    %122 = arith.negf %121 : vector<2x384xf32>
    %123 = math.exp %122 : vector<2x384xf32>
    %cst_41 = arith.constant 1.000000e+00 : f32
    %124 = vector.broadcast %cst_41 : f32 to vector<2x384xf32>
    %125 = arith.addf %124, %123 : vector<2x384xf32>
    %126 = arith.divf %124, %125 : vector<2x384xf32>
    %127 = vector.extract_strided_slice %126 {offsets = [0, 0], sizes = [2, 128], strides = [1, 1]} : vector<2x384xf32> to vector<2x128xf32>
    %128 = vector.extract_strided_slice %126 {offsets = [0, 128], sizes = [2, 128], strides = [1, 1]} : vector<2x384xf32> to vector<2x128xf32>
    %129 = vector.extract_strided_slice %126 {offsets = [0, 256], sizes = [2, 128], strides = [1, 1]} : vector<2x384xf32> to vector<2x128xf32>
    %130 = vector.extract_strided_slice %120 {offsets = [0, 384], sizes = [2, 128], strides = [1, 1]} : vector<2x512xf32> to vector<2x128xf32>
    %131 = math.tanh %130 : vector<2x128xf32>
    %132 = arith.mulf %128, %112 : vector<2x128xf32>
    %133 = arith.mulf %127, %131 : vector<2x128xf32>
    %134 = arith.addf %132, %133 : vector<2x128xf32>
    %135 = math.tanh %134 : vector<2x128xf32>
    %136 = arith.mulf %129, %135 : vector<2x128xf32>
    %c0_42 = arith.constant 0 : index
    %c5 = arith.constant 5 : index
    %c0_43 = arith.constant 0 : index
    %137 = vector.load %arg7[%c0_42, %c5, %c0_43] : memref<2x8x128xf32, #tpu.memory_space<vmem>>, vector<2x1x128xf32>
    %138 = vector.shape_cast %137 : vector<2x1x128xf32> to vector<2x128xf32>
    %139 = vector.shape_cast %136 : vector<2x128xf32> to vector<2x1x128xf32>
    tpu.vector_store %arg7[%c0_42, %c5, %c0_43], %139 {strides = array<i32>} : memref<2x8x128xf32, #tpu.memory_space<vmem>>, vector<2x1x128xf32>,
    %c0_44 = arith.constant 0 : index
    %c0_45 = arith.constant 0 : index
    %140 = vector.load %arg2[%c0_44, %c0_45] : memref<128x512xf32, #tpu.memory_space<vmem>>, vector<128x512xf32>
    %cst_46 = arith.constant dense<0.000000e+00> : vector<2x512xf32>
    %141 = tpu.matmul %136, %140, %cst_46 {dimension_numbers = #tpu.dot_dimension_numbers<[1], [0], [0], [1], [0, 0, 1, 1], [], []>} : vector<2x128xf32>, vector<128x512xf32>, vector<2x512xf32> -> vector<2x512xf32>
    %142 = arith.addf %5, %141 : vector<2x512xf32>
    %143 = vector.extract_strided_slice %142 {offsets = [0, 0], sizes = [2, 384], strides = [1, 1]} : vector<2x512xf32> to vector<2x384xf32>
    %144 = arith.negf %143 : vector<2x384xf32>
    %145 = math.exp %144 : vector<2x384xf32>
    %cst_47 = arith.constant 1.000000e+00 : f32
    %146 = vector.broadcast %cst_47 : f32 to vector<2x384xf32>
    %147 = arith.addf %146, %145 : vector<2x384xf32>
    %148 = arith.divf %146, %147 : vector<2x384xf32>
    %149 = vector.extract_strided_slice %148 {offsets = [0, 0], sizes = [2, 128], strides = [1, 1]} : vector<2x384xf32> to vector<2x128xf32>
    %150 = vector.extract_strided_slice %148 {offsets = [0, 128], sizes = [2, 128], strides = [1, 1]} : vector<2x384xf32> to vector<2x128xf32>
    %151 = vector.extract_strided_slice %148 {offsets = [0, 256], sizes = [2, 128], strides = [1, 1]} : vector<2x384xf32> to vector<2x128xf32>
    %152 = vector.extract_strided_slice %142 {offsets = [0, 384], sizes = [2, 128], strides = [1, 1]} : vector<2x512xf32> to vector<2x128xf32>
    %153 = math.tanh %152 : vector<2x128xf32>
    %154 = arith.mulf %150, %134 : vector<2x128xf32>
    %155 = arith.mulf %149, %153 : vector<2x128xf32>
    %156 = arith.addf %154, %155 : vector<2x128xf32>
    %157 = math.tanh %156 : vector<2x128xf32>
    %158 = arith.mulf %151, %157 : vector<2x128xf32>
    %c0_48 = arith.constant 0 : index
    %c6 = arith.constant 6 : index
    %c0_49 = arith.constant 0 : index
    %159 = vector.load %arg7[%c0_48, %c6, %c0_49] : memref<2x8x128xf32, #tpu.memory_space<vmem>>, vector<2x1x128xf32>
    %160 = vector.shape_cast %159 : vector<2x1x128xf32> to vector<2x128xf32>
    %161 = vector.shape_cast %158 : vector<2x128xf32> to vector<2x1x128xf32>
    tpu.vector_store %arg7[%c0_48, %c6, %c0_49], %161 {strides = array<i32>} : memref<2x8x128xf32, #tpu.memory_space<vmem>>, vector<2x1x128xf32>,
    %c0_50 = arith.constant 0 : index
    %c0_51 = arith.constant 0 : index
    %162 = vector.load %arg2[%c0_50, %c0_51] : memref<128x512xf32, #tpu.memory_space<vmem>>, vector<128x512xf32>
    %cst_52 = arith.constant dense<0.000000e+00> : vector<2x512xf32>
    %163 = tpu.matmul %158, %162, %cst_52 {dimension_numbers = #tpu.dot_dimension_numbers<[1], [0], [0], [1], [0, 0, 1, 1], [], []>} : vector<2x128xf32>, vector<128x512xf32>, vector<2x512xf32> -> vector<2x512xf32>
    %164 = arith.addf %5, %163 : vector<2x512xf32>
    %165 = vector.extract_strided_slice %164 {offsets = [0, 0], sizes = [2, 384], strides = [1, 1]} : vector<2x512xf32> to vector<2x384xf32>
    %166 = arith.negf %165 : vector<2x384xf32>
    %167 = math.exp %166 : vector<2x384xf32>
    %cst_53 = arith.constant 1.000000e+00 : f32
    %168 = vector.broadcast %cst_53 : f32 to vector<2x384xf32>
    %169 = arith.addf %168, %167 : vector<2x384xf32>
    %170 = arith.divf %168, %169 : vector<2x384xf32>
    %171 = vector.extract_strided_slice %170 {offsets = [0, 0], sizes = [2, 128], strides = [1, 1]} : vector<2x384xf32> to vector<2x128xf32>
    %172 = vector.extract_strided_slice %170 {offsets = [0, 128], sizes = [2, 128], strides = [1, 1]} : vector<2x384xf32> to vector<2x128xf32>
    %173 = vector.extract_strided_slice %170 {offsets = [0, 256], sizes = [2, 128], strides = [1, 1]} : vector<2x384xf32> to vector<2x128xf32>
    %174 = vector.extract_strided_slice %164 {offsets = [0, 384], sizes = [2, 128], strides = [1, 1]} : vector<2x512xf32> to vector<2x128xf32>
    %175 = math.tanh %174 : vector<2x128xf32>
    %176 = arith.mulf %172, %156 : vector<2x128xf32>
    %177 = arith.mulf %171, %175 : vector<2x128xf32>
    %178 = arith.addf %176, %177 : vector<2x128xf32>
    %179 = math.tanh %178 : vector<2x128xf32>
    %180 = arith.mulf %173, %179 : vector<2x128xf32>
    %c0_54 = arith.constant 0 : index
    %c7 = arith.constant 7 : index
    %c0_55 = arith.constant 0 : index
    %181 = vector.load %arg7[%c0_54, %c7, %c0_55] : memref<2x8x128xf32, #tpu.memory_space<vmem>>, vector<2x1x128xf32>
    %182 = vector.shape_cast %181 : vector<2x1x128xf32> to vector<2x128xf32>
    %183 = vector.shape_cast %180 : vector<2x128xf32> to vector<2x1x128xf32>
    tpu.vector_store %arg7[%c0_54, %c7, %c0_55], %183 {strides = array<i32>} : memref<2x8x128xf32, #tpu.memory_space<vmem>>, vector<2x1x128xf32>,
    %c0_56 = arith.constant 0 : index
    %c0_57 = arith.constant 0 : index
    %c0_58 = arith.constant 0 : index
    %184 = vector.load %arg7[%c0_56, %c0_57, %c0_58] : memref<2x8x128xf32, #tpu.memory_space<vmem>>, vector<2x8x128xf32>
    %cst_59 = arith.constant 0.000000e+00 : f32
    %185 = vector.broadcast %cst_59 : f32 to vector<2x8x128xf32>
    %186 = arith.maximumf %184, %185 : vector<2x8x128xf32>
    %187 = vector.shape_cast %186 : vector<2x8x128xf32> to vector<16x128xf32>
    %c0_60 = arith.constant 0 : index
    %c0_61 = arith.constant 0 : index
    %188 = vector.load %arg4[%c0_60, %c0_61] : memref<128x128xf32, #tpu.memory_space<vmem>>, vector<128x128xf32>
    %cst_62 = arith.constant dense<0.000000e+00> : vector<16x128xf32>
    %189 = tpu.matmul %187, %188, %cst_62 {dimension_numbers = #tpu.dot_dimension_numbers<[1], [0], [0], [1], [0, 0, 1, 1], [], []>} : vector<16x128xf32>, vector<128x128xf32>, vector<16x128xf32> -> vector<16x128xf32>
    %c0_63 = arith.constant 0 : index
    %c0_64 = arith.constant 0 : index
    %190 = vector.load %arg5[%c0_63, %c0_64] : memref<1x128xf32, #tpu.memory_space<vmem>>, vector<1x128xf32>
    %191 = vector.broadcast %190 : vector<1x128xf32> to vector<16x128xf32>
    %192 = arith.addf %189, %191 : vector<16x128xf32>
    %193 = vector.shape_cast %192 : vector<16x128xf32> to vector<2x8x128xf32>
    %c0_65 = arith.constant 0 : index
    %c0_66 = arith.constant 0 : index
    %c0_67 = arith.constant 0 : index
    %194 = vector.load %arg6[%c0_65, %c0_66, %c0_67] : memref<2x8x128xf32, #tpu.memory_space<vmem>>, vector<2x8x128xf32>
    tpu.vector_store %arg6[%c0_65, %c0_66, %c0_67], %193 {strides = array<i32>} : memref<2x8x128xf32, #tpu.memory_space<vmem>>, vector<2x8x128xf32>,
    return
  }
}

</mosaic_0001>

<bundles_post_ra>
// kernel: lstm_decoder_forward.1
= control target key start
LH: loop header
LB: loop body
LE: loop exit
PB: predicated region body
PF: predicated region fallthrough
CT: control target
= control target key end

     0   :  { %11 = vsyncpa [#allocation4], 0  ;;  %s3931_s0 = inlined_call_operand.hbm [shape: f32[2,32], index: 0, kind: input, shape index: {}]   ;;  %s3932_s1 = inlined_call_operand.hbm [shape: f32[32,512], index: 1, kind: input, shape index: {}]   ;;  %s3933_s2 = inlined_call_operand.hbm [shape: f32[128,512], index: 2, kind: input, shape index: {}]   ;;  %s3934_s3 = inlined_call_operand.vmem [shape: f32[1,512], index: 3, kind: input, shape index: {}]   ;;  %s3935_s4 = inlined_call_operand.hbm [shape: f32[128,128], index: 4, kind: input, shape index: {}]   ;;  %s3936_s5 = inlined_call_operand.vmem [shape: f32[1,128], index: 5, kind: input, shape index: {}]   ;;  %s3937_s6 = inlined_call_operand.vmem [shape: f32[2,8,128], index: 6, kind: output, shape index: {}]  }
   0x1   :  { %12 = vsyncpa [#allocation6], 0 }
   0x2   :  { %13 = vsyncpa [#allocation9], 0  ;;  %s3348_s21 = smov [#allocation5]   ;;  %s3254_s25 = scalar_lea.hbm %s3932_s1, 2048 }
   0x3   :  { %s29_s22 = sshll.u32 %s3348_s21, 4  ;;  %p3255_p0 = scmp.ne.s32.totalorder %s3932_s1, %s3254_s25  ;;  %s30_s22 = int_to_ptr.vmem [resolvable:$true] %s29_s22 }
   0x4   :  { %p3258_p1 = scmp.lt.u32.totalorder %s3254_s25, %s3932_s1 }
   0x6   :  { %p3260_p2 = pnand %p3258_p1, %p3255_p0 }
   0x8   :  { %3263 = shalt.err (!%p3260_p2)
}
   0x9   :  { %s3264_s30 = scalar_lea.vmem %s30_s22, 2048  ;;  %p3269_p4 = scmp.lt.s32.totalorder %s30_s22, %s30_s22 }
   0xa   :  { %p3265_p3 = scmp.ne.s32.totalorder %s30_s22, %s3264_s30  ;;  %p3270_p5 = scmp.lt.s32.totalorder %s3264_s30, %s3264_s30 }
   0xc   :  { %p3271_p6 = por %p3270_p5, %p3269_p4 }
   0xe   :  { %p3272_p7 = pnand %p3271_p6, %p3265_p3 }
  0x10   :  { %3275 = shalt.err (!%p3272_p7)
}
  0x11   :  { %s3349_s7 = smov 512   ;;  %s3350_s8 = smov 32  }
  0x12   :  { %35 = dma.hbm_to_vmem [thread:$0]  %s3932_s1, 2048, %s30_s22, [#allocation6], %s3349_s7, %s3349_s7, %s3350_s8  }
  0x13   :  { %s3351_s11 = smov [#allocation3]   ;;  %s3352_s13 = smov [#allocation7]  }
  0x14   :  { %s20_s12 = sshll.u32 %s3351_s11, 4  ;;  %s41_s14 = sshll.u32 %s3352_s13, 4  ;;  %s21_s12 = int_to_ptr.vmem [resolvable:$true] %s20_s12  ;;  %s42_s14 = int_to_ptr.vmem [resolvable:$true] %s41_s14 }
  0x15   :  { %s3276_s17 = scalar_lea.hbm %s3931_s0, 32 }
  0x16   :  { %p3277_p8 = scmp.ne.s32.totalorder %s3931_s0, %s3276_s17  ;;  %p3280_p9 = scmp.lt.u32.totalorder %s3276_s17, %s3931_s0 }
  0x18   :  { %p3282_p10 = pnand %p3280_p9, %p3277_p8 }
  0x1a   :  { %3285 = shalt.err (!%p3282_p10)
}
  0x1b   :  { %s3286_s1 = scalar_lea.vmem %s21_s12, 32  ;;  %p3291_p12 = scmp.lt.s32.totalorder %s21_s12, %s21_s12 }
  0x1c   :  { %p3287_p11 = scmp.ne.s32.totalorder %s21_s12, %s3286_s1  ;;  %p3292_p13 = scmp.lt.s32.totalorder %s3286_s1, %s3286_s1 }
  0x1e   :  { %p3293_p0 = por %p3292_p13, %p3291_p12 }
  0x20   :  { %p3294_p1 = pnand %p3293_p0, %p3287_p11 }
  0x22   :  { %3297 = shalt.err (!%p3294_p1)
}
  0x23   :  { %23 = dma.hbm_to_vmem [thread:$0]  %s3931_s0, 32, %s21_s12, [#allocation4]  }
  0x24   :  { %s3298_s26 = scalar_lea.hbm %s3933_s2, 8192 }
  0x25   :  { %p3299_p2 = scmp.ne.s32.totalorder %s3933_s2, %s3298_s26  ;;  %p3302_p3 = scmp.lt.u32.totalorder %s3298_s26, %s3933_s2 }
  0x27   :  { %p3304_p4 = pnand %p3302_p3, %p3299_p2 }
  0x29   :  { %3307 = shalt.err (!%p3304_p4)
}
  0x2a   :  { %s3308_s9 = scalar_lea.vmem %s42_s14, 8192  ;;  %p3313_p6 = scmp.lt.s32.totalorder %s42_s14, %s42_s14 }
  0x2b   :  { %p3309_p5 = scmp.ne.s32.totalorder %s42_s14, %s3308_s9  ;;  %p3314_p7 = scmp.lt.s32.totalorder %s3308_s9, %s3308_s9 }
  0x2d   :  { %p3315_p8 = por %p3314_p7, %p3313_p6 }
  0x2f   :  { %p3316_p9 = pnand %p3315_p8, %p3309_p5 }
  0x31   :  { %3319 = shalt.err (!%p3316_p9)
}
  0x32   :  { %47 = dma.hbm_to_vmem [thread:$0]  %s3933_s2, 8192, %s42_s14, [#allocation6], %s3349_s7, %s3349_s7, %s3350_s8  }
  0x33   :  { %s3353_s11 = smov [#allocation8]   ;;  %s3320_s16 = scalar_lea.hbm %s3935_s4, 2048 }
  0x34   :  { %s55_s12 = sshll.u32 %s3353_s11, 4  ;;  %p3321_p10 = scmp.ne.s32.totalorder %s3935_s4, %s3320_s16  ;;  %s56_s12 = int_to_ptr.vmem [resolvable:$true] %s55_s12 }
  0x35   :  { %p3324_p11 = scmp.lt.u32.totalorder %s3320_s16, %s3935_s4 }
  0x37   :  { %p3326_p12 = pnand %p3324_p11, %p3321_p10 }
  0x39   :  { %3329 = shalt.err (!%p3326_p12)
}
  0x3a   :  { %s3330_s21 = scalar_lea.vmem %s56_s12, 2048  ;;  %p3335_p0 = scmp.lt.s32.totalorder %s56_s12, %s56_s12 }
  0x3b   :  { %p3331_p13 = scmp.ne.s32.totalorder %s56_s12, %s3330_s21  ;;  %p3336_p1 = scmp.lt.s32.totalorder %s3330_s21, %s3330_s21 }
  0x3d   :  { %p3337_p2 = por %p3336_p1, %p3335_p0 }
  0x3f   :  { %p3338_p3 = pnand %p3337_p2, %p3331_p13 }
  0x41   :  { %3341 = shalt.err (!%p3338_p3)
}
  0x42   :  { %s3354_s2 = smov 128   ;;  %s3355_s7 = smov 8  }
  0x43   :  { %61 = dma.hbm_to_vmem [thread:$0]  %s3935_s4, 2048, %s56_s12, [#allocation9], %s3354_s2, %s3354_s2, %s3355_s7  }
  0x44   :  { %3342 = dma.done.wait [#allocation4], 32  }
  0x45   :  { %3343 = vsyncadd [#allocation4], 4294967264 }
  0x46   :  { %3344 = dma.done.wait [#allocation6], 10240  }
  0x47   :  { %3345 = vsyncadd [#allocation6], 4294957056 }
  0x48   :  { %3346 = dma.done.wait [#allocation9], 2048  }
  0x49   :  { %3347 = vsyncadd [#allocation9], 4294965248  ;;  %v3356_v0 = vmov 0.0   ;;  %v78_v1 = vld [vmem:[#allocation5 + $0x8] sm:$0xff]  ;;  %v77_v6 = vld [vmem:[#allocation5] sm:$0xff]  ;;  %vm115_vm0 = vcmask 261120  }
  0x4a   :  { %183 = vmatprep.mubr.f32.mxu1 %v3356_v0  ;;  %389 = vmatprep.mubr.f32.mxu0 %v3356_v0  ;;  %v82_v2 = vld [vmem:[#allocation5 + $0x28] sm:$0xff]  ;;  %v81_v7 = vld [vmem:[#allocation5 + $0x20] sm:$0xff]  ;;  %v80_v24 = vld [vmem:[#allocation5 + $0x18] sm:$0xff] }
  0x4b   :  { %v262_v3 = vld [vmem:[#allocation7 + $0x8] sm:$0xff]  ;;  %v2556_v4 = vpack.c.bf16 %v82_v2, %v78_v1  ;;  %v2558_v9 = vpack.c.bf16 %v81_v7, %v77_v6  ;;  %v261_v10 = vld [vmem:[#allocation7] sm:$0xff]  ;;  %v3460_v26 = vld [vmem:[#allocation3] sm:$0x3] }
  0x4c   :  { %v266_v5 = vld [vmem:[#allocation7 + $0x28] sm:$0xff]  ;;  %v265_v11 = vld [vmem:[#allocation7 + $0x20] sm:$0xff]  ;;  %v84_v27 = vld [vmem:[#allocation5 + $0x38] sm:$0xff] }
  0x4d   :  { %v3449_v8 = vpack.c.bf16 %v266_v5, %v262_v3  ;;  %v86_v12 = vld [vmem:[#allocation5 + $0x48] sm:$0xff]  ;;  %2557 = vmatprep.subr.bf16.mxu1 %v2556_v4  ;;  %v3451_v13 = vpack.c.bf16 %v265_v11, %v261_v10  ;;  %v85_v19 = vld [vmem:[#allocation5 + $0x40] sm:$0xff]  ;;  %v2564_v30 = vpack.c.bf16 %v84_v27, %v80_v24  ;;  %v79_v32 = vld [vmem:[#allocation5 + $0x10] sm:$0xff] }
  0x4e   :  { %v90_v14 = vld [vmem:[#allocation5 + $0x68] sm:$0xff]  ;;  %2559 = vmatpush1.bf16.msra.mxu1 %v2558_v9  ;;  %v89_v20 = vld [vmem:[#allocation5 + $0x60] sm:$0xff]  ;;  %v83_v33 = vld [vmem:[#allocation5 + $0x30] sm:$0xff] }
  0x4f   :  { %v270_v15 = vld [vmem:[#allocation7 + $0x48] sm:$0xff]  ;;  %2573 = vmatprep.subr.bf16.mxu0 %v3449_v8  ;;  %v2560_v17 = vpack.c.bf16 %v90_v14, %v86_v12  ;;  %v269_v21 = vld [vmem:[#allocation7 + $0x40] sm:$0xff]  ;;  %v2562_v22 = vpack.c.bf16 %v89_v20, %v85_v19  ;;  %v2566_v35 = vpack.c.bf16 %v83_v33, %v79_v32  ;;  %v88_v37 = vld [vmem:[#allocation5 + $0x58] sm:$0xff] }
  0x50   :  { %v274_v16 = vld [vmem:[#allocation7 + $0x68] sm:$0xff]  ;;  %2575 = vmatpush1.bf16.msra.mxu0 %v3451_v13  ;;  %v273_v23 = vld [vmem:[#allocation7 + $0x60] sm:$0xff]  ;;  %v92_v38 = vld [vmem:[#allocation5 + $0x78] sm:$0xff] }
  0x51   :  { %v3454_v18 = vpack.c.bf16 %v274_v16, %v270_v15  ;;  %2561 = vmatprep.subr.bf16.mxu1 %v2560_v17  ;;  %v3458_v25 = vpack.c.bf16 %v273_v23, %v269_v21  ;;  %v278_v28 = vld [vmem:[#allocation7 + $0x88] sm:$0xff]  ;;  %v277_v34 = vld [vmem:[#allocation7 + $0x80] sm:$0xff]  ;;  %v2568_v40 = vpack.c.bf16 %v92_v38, %v88_v37  ;;  %v87_v43 = vld [vmem:[#allocation5 + $0x50] sm:$0xff] }
  0x52   :  { %v282_v29 = vld [vmem:[#allocation7 + $0xa8] sm:$0xff]  ;;  %2563 = vmatpush1.bf16.msra.mxu1 %v2562_v22  ;;  %v281_v36 = vld [vmem:[#allocation7 + $0xa0] sm:$0xff]  ;;  %v91_v45 = vld [vmem:[#allocation5 + $0x70] sm:$0xff] }
  0x53   :  { %2577 = vmatprep.subr.bf16.mxu0 %v3454_v18  ;;  %v3462_v31 = vpack.c.bf16 %v282_v29, %v278_v28  ;;  %2565 = vmatprep.subr.bf16.mxu1 %v2564_v30  ;;  %v3465_v39 = vpack.c.bf16 %v281_v36, %v277_v34  ;;  %v286_v41 = vld [vmem:[#allocation7 + $0xc8] sm:$0xff]  ;;  %v285_v46 = vld [vmem:[#allocation7 + $0xc0] sm:$0xff]  ;;  %v264_v50 = vld [vmem:[#allocation7 + $0x18] sm:$0xff]  ;;  %v2570_v51 = vpack.c.bf16 %v91_v45, %v87_v43 }
  0x54   :  { %2579 = vmatpush1.bf16.msra.mxu0 %v3458_v25  ;;  %v290_v42 = vld [vmem:[#allocation7 + $0xe8] sm:$0xff]  ;;  %v289_v47 = vld [vmem:[#allocation7 + $0xe0] sm:$0xff]  ;;  %v268_v52 = vld [vmem:[#allocation7 + $0x38] sm:$0xff] }
  0x55   :  { %2581 = vmatprep.subr.bf16.mxu0 %v3462_v31  ;;  %v3468_v44 = vpack.c.bf16 %v290_v42, %v286_v41  ;;  %2460 = vmatmul.mubr.msk.f32.vlgmr.msra.gmra.mrb[0].mxu1 %vm115_vm0, %v3460_v26  ;;  %v294_v48 = vld [vmem:[#allocation7 + $0x108] sm:$0xff]  ;;  %v3474_v53 = vpack.c.bf16 %v289_v47, %v285_v46  ;;  %v3476_v54 = vpack.c.bf16 %v268_v52, %v264_v50  ;;  %v293_v55 = vld [vmem:[#allocation7 + $0x100] sm:$0xff]  ;;  %v263_v56 = vld [vmem:[#allocation7 + $0x10] sm:$0xff] }
  0x56   :  { %v298_v49 = vld [vmem:[#allocation7 + $0x128] sm:$0xff]  ;;  %2567 = vmatpush1.bf16.msra.mxu1 %v2566_v35  ;;  %254 = vmatprep.mubr.f32.mxu1 %v3356_v0  ;;  %v267_v57 = vld [vmem:[#allocation7 + $0x30] sm:$0xff]  ;;  %v297_v59 = vld [vmem:[#allocation7 + $0x120] sm:$0xff] }
  0x57   :  { %2569 = vmatprep.subr.bf16.mxu1 %v2568_v40  ;;  %v3479_v58 = vpack.c.bf16 %v298_v49, %v294_v48  ;;  %v272_v60 = vld [vmem:[#allocation7 + $0x58] sm:$0xff]  ;;  %v302_v62 = vld [vmem:[#allocation7 + $0x148] sm:$0xff]  ;;  %v3481_v1 = vpack.c.bf16 %v267_v57, %v263_v56  ;;  %v3485_v2 = vpack.c.bf16 %v297_v59, %v293_v55  ;;  %v301_v4 = vld [vmem:[#allocation7 + $0x140] sm:$0xff] }
  0x58   :  { %2583 = vmatpush1.bf16.msra.mxu0 %v3465_v39  ;;  %v276_v61 = vld [vmem:[#allocation7 + $0x78] sm:$0xff]  ;;  %v306_v63 = vld [vmem:[#allocation7 + $0x168] sm:$0xff]  ;;  %v271_v5 = vld [vmem:[#allocation7 + $0x50] sm:$0xff] }
  0x59   :  { %2585 = vmatprep.subr.bf16.mxu0 %v3468_v44  ;;  %v3487_v3 = vpack.c.bf16 %v276_v61, %v272_v60  ;;  %v275_v6 = vld [vmem:[#allocation7 + $0x70] sm:$0xff]  ;;  %v3490_v7 = vpack.c.bf16 %v306_v63, %v302_v62  ;;  %v305_v9 = vld [vmem:[#allocation7 + $0x160] sm:$0xff]  ;;  %v280_v10 = vld [vmem:[#allocation7 + $0x98] sm:$0xff] }
  0x5a   :  { %2571 = vmatpush1.bf16.msra.mxu1 %v2570_v51  ;;  %v284_v11 = vld [vmem:[#allocation7 + $0xb8] sm:$0xff]  ;;  %v310_v12 = vld [vmem:[#allocation7 + $0x188] sm:$0xff]  ;;  %v3495_v15 = vpack.c.bf16 %v275_v6, %v271_v5  ;;  %v3500_v16 = vpack.c.bf16 %v305_v9, %v301_v4  ;;  %v309_v19 = vld [vmem:[#allocation7 + $0x180] sm:$0xff] }
  0x5b   :  { %2605 = vmatprep.subr.bf16.mxu1 %v3476_v54  ;;  %v314_v14 = vld [vmem:[#allocation7 + $0x1a8] sm:$0xff]  ;;  %v3502_v17 = vpack.c.bf16 %v284_v11, %v280_v10  ;;  %v279_v20 = vld [vmem:[#allocation7 + $0x90] sm:$0xff]  ;;  %v313_v23 = vld [vmem:[#allocation7 + $0x1a0] sm:$0xff] }
  0x5c   :  { %2587 = vmatpush1.bf16.msra.mxu0 %v3474_v53  ;;  %v283_v21 = vld [vmem:[#allocation7 + $0xb0] sm:$0xff]  ;;  %v3505_v22 = vpack.c.bf16 %v314_v14, %v310_v12  ;;  %v288_v24 = vld [vmem:[#allocation7 + $0xd8] sm:$0xff]  ;;  %v318_v27 = vld [vmem:[#allocation7 + $0x1c8] sm:$0xff]  ;;  %v3512_v30 = vpack.c.bf16 %v313_v23, %v309_v19  ;;  %v95_v14 = vlaneseq }
  0x5d   :  { %2589 = vmatprep.subr.bf16.mxu0 %v3479_v58  ;;  %2461 = vmatmul.mubr.msk.f32.vlgmr.msra.gmra.mrb[2].mxu1 %vm115_vm0, %v3460_v26  ;;  %v292_v26 = vld [vmem:[#allocation7 + $0xf8] sm:$0xff]  ;;  %v322_v28 = vld [vmem:[#allocation7 + $0x1e8] sm:$0xff]  ;;  %v3508_v29 = vpack.c.bf16 %v283_v21, %v279_v20  ;;  %v317_v33 = vld [vmem:[#allocation7 + $0x1c0] sm:$0xff] }
  0x5e   :  { %2607 = vmatpush1.bf16.msra.mxu1 %v3481_v1  ;;  %460 = vmatprep.mubr.f32.mxu1 %v3356_v0  ;;  %v3514_v32 = vpack.c.bf16 %v292_v26, %v288_v24  ;;  %v287_v34 = vld [vmem:[#allocation7 + $0xd0] sm:$0xff]  ;;  %v3517_v36 = vpack.c.bf16 %v322_v28, %v318_v27  ;;  %v321_v37 = vld [vmem:[#allocation7 + $0x1e0] sm:$0xff]  ;;  %v296_v38 = vld [vmem:[#allocation7 + $0x118] sm:$0xff]  ;;  %v96_v20 = vshrl.u32 %v95_v14, 7 }
  0x5f   :  { %2609 = vmatprep.subr.bf16.mxu1 %v3487_v3  ;;  %v291_v35 = vld [vmem:[#allocation7 + $0xf0] sm:$0xff]  ;;  %v300_v40 = vld [vmem:[#allocation7 + $0x138] sm:$0xff]  ;;  %v3524_v42 = vpack.c.bf16 %v321_v37, %v317_v33 }
  0x60   :  { %2591 = vmatpush1.bf16.msra.mxu0 %v3485_v2  ;;  %v3520_v41 = vpack.c.bf16 %v291_v35, %v287_v34  ;;  %v3526_v43 = vpack.c.bf16 %v300_v40, %v296_v38  ;;  %v295_v45 = vld [vmem:[#allocation7 + $0x110] sm:$0xff]  ;;  %v304_v47 = vld [vmem:[#allocation7 + $0x158] sm:$0xff]  ;;  %v97_v21 = vsub.s32 0, %v96_v20  ;;  %v101_v24 = vsub.s32 1, %v96_v20 }
  0x61   :  { %2593 = vmatprep.subr.bf16.mxu0 %v3490_v7  ;;  %v299_v46 = vld [vmem:[#allocation7 + $0x130] sm:$0xff]  ;;  %v308_v48 = vld [vmem:[#allocation7 + $0x178] sm:$0xff] }
  0x62   :  { %2611 = vmatpush1.bf16.msra.mxu1 %v3495_v15  ;;  %v3530_v49 = vpack.c.bf16 %v299_v46, %v295_v45  ;;  %v3534_v50 = vpack.c.bf16 %v308_v48, %v304_v47  ;;  %v303_v51 = vld [vmem:[#allocation7 + $0x150] sm:$0xff]  ;;  %v312_v55 = vld [vmem:[#allocation7 + $0x198] sm:$0xff]  ;;  %v105_v46 = vsub.s32 2, %v96_v20  ;;  %v109_v47 = vsub.s32 3, %v96_v20 }
  0x63   :  { %2613 = vmatprep.subr.bf16.mxu1 %v3502_v17  ;;  %v307_v52 = vld [vmem:[#allocation7 + $0x170] sm:$0xff]  ;;  %v316_v56 = vld [vmem:[#allocation7 + $0x1b8] sm:$0xff] }
  0x64   :  { %2595 = vmatpush1.bf16.msra.mxu0 %v3500_v16  ;;  %v3539_v57 = vpack.c.bf16 %v307_v52, %v303_v51  ;;  %v3542_v59 = vpack.c.bf16 %v316_v56, %v312_v55  ;;  %v311_v60 = vld [vmem:[#allocation7 + $0x190] sm:$0xff]  ;;  %v320_v62 = vld [vmem:[#allocation7 + $0x1d8] sm:$0xff] }
  0x65   :  { %2597 = vmatprep.subr.bf16.mxu0 %v3505_v22  ;;  %v315_v61 = vld [vmem:[#allocation7 + $0x1b0] sm:$0xff]  ;;  %v324_v63 = vld [vmem:[#allocation7 + $0x1f8] sm:$0xff] }
  0x66   :  { %2615 = vmatpush1.bf16.msra.mxu1 %v3508_v29  ;;  %v3548_v4 = vpack.c.bf16 %v315_v61, %v311_v60  ;;  %v3551_v5 = vpack.c.bf16 %v324_v63, %v320_v62  ;;  %v319_v6 = vld [vmem:[#allocation7 + $0x1d0] sm:$0xff] }
  0x67   :  { %2617 = vmatprep.subr.bf16.mxu1 %v3514_v32  ;;  %v323_v9 = vld [vmem:[#allocation7 + $0x1f0] sm:$0xff] }
  0x68   :  { %2599 = vmatpush1.bf16.msra.mxu0 %v3512_v30  ;;  %v3556_v10 = vpack.c.bf16 %v323_v9, %v319_v6  ;;  %v93_v23 = vld [vmem:[%s3934_s3] sm:$0xf] }
  0x69   :  { %2601 = vmatprep.subr.bf16.mxu0 %v3517_v36  ;;  %v98_v26 = vrot.slane %v93_v23, %v97_v21  ;;  %v102_v27 = vrot.slane %v93_v23, %v101_v24  ;;  %v106_v48 = vrot.slane %v93_v23, %v105_v46  ;;  %v110_v51 = vrot.slane %v93_v23, %v109_v47 }
  0x6a   :  { %2619 = vmatpush1.bf16.msra.mxu1 %v3520_v41 }
  0x6b   :  { %2621 = vmatprep.subr.bf16.mxu1 %v3526_v43 }
  0x6c   :  { %2603 = vmatpush1.bf16.msra.mxu0 %v3524_v42 }
  0x6d   :  { %2637 = vmatprep.subr.bf16.mxu0 %v3449_v8 }
  0x6e   :  { %2623 = vmatpush1.bf16.msra.mxu1 %v3530_v49 }
  0x6f   :  { %390 = vmatmul.mubr.f32.vlgmr.msra.gmra.mrb[0].mxu0 %v3356_v0  ;;  %2625 = vmatprep.subr.bf16.mxu1 %v3534_v50 }
  0x70   :  { %2639 = vmatpush1.bf16.msra.mxu0 %v3451_v13  ;;  %650 = vmatprep.mubr.f32.mxu0 %v3356_v0 }
  0x71   :  { %2641 = vmatprep.subr.bf16.mxu0 %v3454_v18 }
  0x72   :  { %2627 = vmatpush1.bf16.msra.mxu1 %v3539_v57 }
  0x73   :  { %2629 = vmatprep.subr.bf16.mxu1 %v3542_v59 }
  0x74   :  { %2643 = vmatpush1.bf16.msra.mxu0 %v3458_v25 }
  0x75   :  { %2645 = vmatprep.subr.bf16.mxu0 %v3462_v31 }
  0x76   :  { %2631 = vmatpush1.bf16.msra.mxu1 %v3548_v4 }
  0x77   :  { %2633 = vmatprep.subr.bf16.mxu1 %v3551_v5 }
  0x78   :  { %2647 = vmatpush1.bf16.msra.mxu0 %v3465_v39 }
  0x79   :  { %2649 = vmatprep.subr.bf16.mxu0 %v3468_v44 }
  0x7a   :  { %2635 = vmatpush1.bf16.msra.mxu1 %v3556_v10 }
  0x7b   :  { %2669 = vmatprep.subr.bf16.mxu1 %v3476_v54 }
  0x7c   :  { %2651 = vmatpush1.bf16.msra.mxu0 %v3474_v53 }
  0x7d   :  { %2653 = vmatprep.subr.bf16.mxu0 %v3479_v58  ;;  %461 = vmatmul.mubr.f32.vlgmr.msra.gmra.mrb[4].mxu1 %v3356_v0 }
  0x7e   :  { %2671 = vmatpush1.bf16.msra.mxu1 %v3481_v1  ;;  %721 = vmatprep.mubr.f32.mxu1 %v3356_v0 }
  0x7f   :  { %2673 = vmatprep.subr.bf16.mxu1 %v3487_v3 }
  0x80   :  { %2655 = vmatpush1.bf16.msra.mxu0 %v3485_v2 }
  0x81   :  { %2657 = vmatprep.subr.bf16.mxu0 %v3490_v7 }
  0x82   :  { %2675 = vmatpush1.bf16.msra.mxu1 %v3495_v15 }
  0x83   :  { %2677 = vmatprep.subr.bf16.mxu1 %v3502_v17 }
  0x84   :  { %2659 = vmatpush1.bf16.msra.mxu0 %v3500_v16 }
  0x85   :  { %2661 = vmatprep.subr.bf16.mxu0 %v3505_v22 }
  0x86   :  { %2679 = vmatpush1.bf16.msra.mxu1 %v3508_v29 }
  0x87   :  { %2681 = vmatprep.subr.bf16.mxu1 %v3514_v32 }
  0x88   :  { %2663 = vmatpush1.bf16.msra.mxu0 %v3512_v30 }
  0x89   :  { %2665 = vmatprep.subr.bf16.mxu0 %v3517_v36 }
  0x8a   :  { %2683 = vmatpush1.bf16.msra.mxu1 %v3520_v41 }
  0x8b   :  { %2685 = vmatprep.subr.bf16.mxu1 %v3526_v43 }
  0x8c   :  { %2667 = vmatpush1.bf16.msra.mxu0 %v3524_v42 }
  0x8d   :  { %2701 = vmatprep.subr.bf16.mxu0 %v3449_v8 }
  0x8e   :  { %2687 = vmatpush1.bf16.msra.mxu1 %v3530_v49 }
  0x8f   :  { %2689 = vmatprep.subr.bf16.mxu1 %v3534_v50 }
  0x92   :  { %2691 = vmatpush1.bf16.msra.mxu1 %v3539_v57 }
  0x93   :  { %2693 = vmatprep.subr.bf16.mxu1 %v3542_v59 }
  0x96   :  { %2695 = vmatpush1.bf16.msra.mxu1 %v3548_v4 }
  0x97   :  { %2697 = vmatprep.subr.bf16.mxu1 %v3551_v5 }
  0x9a   :  { %2699 = vmatpush1.bf16.msra.mxu1 %v3556_v10 }
  0x9b   :  { %2733 = vmatprep.subr.bf16.mxu1 %v3476_v54 }
 0x128   :  { %v185_v11 = vpop.f32.mrb[0].mxu1 }
 0x129   :  { %v187_v12 = vpop.f32.mrb[1].mxu1  ;;  %v3594_v28 = vadd.f32 %v185_v11, %v98_v26 }
 0x12a   :  { %v3596_v33 = vadd.f32 %v187_v12, %v102_v27 }
 0x130   :  { %v256_v8 = vpop.f32.mrb[2].mxu1 }
 0x131   :  { %v258_v19 = vpop.f32.mrb[3].mxu1  ;;  %v3600_v52 = vadd.f32 %v256_v8, %v106_v48 }
 0x132   :  { %v3602_v56 = vadd.f32 %v258_v19, %v110_v51 }
 0x142   :  { %v391_v34 = vpop.f32.mrb[0].mxu0 }
 0x143   :  { %v467_v35 = vadd.f32 %v391_v34, %v3594_v28  ;;  %v393_v37 = vpop.f32.mrb[1].mxu0  ;;  %v3357_v34 = vmov 1966171168  }
 0x144   :  { %v468_v38 = vadd.f32 %v393_v37, %v3596_v33 }
 0x145   :  { %v2462_v40 = vmul.f32 -1.442695, %v467_v35  ;;  %v497_v35 = vunpack.c.l.s4 %v3357_v34  ;;  %v1072_v34 = vld [vmem:[#allocation7 + $0xe0] sm:$0xff] }
 0x146   :  { %v2463_v45 = vmul.f32 -1.442695, %v468_v38 }
 0x147   :  { %3126 = vpow2.f32 %v2462_v40  ;;  %v498_v37 = vunpack.c.0.s8 %v497_v35 }
 0x148   :  { %3128 = vpow2.f32 %v2463_v45 }
 0x149   :  { %v3609_v40 = vsub.s32 %v498_v37, %v96_v20  ;;  %v1077_v37 = vld [vmem:[#allocation7 + $0x108] sm:$0xff] }
 0x150   :  { %v462_v60 = vpop.f32.mrb[4].mxu1 }
 0x151   :  { %v3127_v55 = vpop.eup %3126  ;;  %v469_v63 = vadd.f32 %v462_v60, %v3600_v52  ;;  %v464_v6 = vpop.f32.mrb[5].mxu1 }
 0x152   :  { %v3129_v61 = vpop.eup %3128  ;;  %v480_v62 = vadd.f32 1.0, %v3127_v55  ;;  %v470_v11 = vadd.f32 %v464_v6, %v3602_v56 }
 0x153   :  { %v481_v9 = vadd.f32 1.0, %v3129_v61  ;;  %v2464_v12 = vmul.f32 -1.442695, %v469_v63 }
 0x154   :  { %3130 = vrcp.f32 %v480_v62 }
 0x155   :  { %3132 = vrcp.f32 %v481_v9 }
 0x156   :  { %3134 = vpow2.f32 %v2464_v12 }
 0x157   :  { %3136 = vtanh.f32 %v470_v11 }
 0x15e   :  { %v3131_v14 = vpop.eup %3130 }
 0x15f   :  { %v3133_v8 = vpop.eup %3132 }
 0x160   :  { %v3135_v21 = vpop.eup %3134  ;;  %v490_v23 = vmul.f32 0.0, %v3133_v8  ;;  %v1060_v8 = vld [vmem:[#allocation7 + $0x80] sm:$0xff] }
 0x161   :  { %v3137_v19 = vpop.eup %3136  ;;  %v482_v24 = vadd.f32 1.0, %v3135_v21  ;;  %v1064_v21 = vld [vmem:[#allocation7 + $0xa0] sm:$0xff] }
 0x162   :  { %v491_v26 = vmul.f32 %v3137_v19, %v3131_v14  ;;  %v1069_v19 = vld [vmem:[#allocation7 + $0xc8] sm:$0xff] }
 0x163   :  { %3138 = vrcp.f32 %v482_v24  ;;  %v1073_v24 = vld [vmem:[#allocation7 + $0xe8] sm:$0xff] }
 0x164   :  { %v3606_v27 = vadd.f32 %v491_v26, %v490_v23  ;;  %v3685_v23 = vpack.c.bf16 %v1064_v21, %v1060_v8  ;;  %v3689_v26 = vpack.c.bf16 %v1073_v24, %v1069_v19 }
 0x166   :  { %3140 = vtanh.f32 %v3606_v27 }
 0x16d   :  { %v3139_v38 = vpop.eup %3138 }
 0x170   :  { %v3141_v45 = vpop.eup %3140 }
 0x171   :  { %v494_v46 = vmul.f32 %v3141_v45, %v3139_v38  ;;  %v1081_v38 = vld [vmem:[#allocation7 + $0x128] sm:$0xff] }
 0x172   :  { %v3695_v45 = vpack.c.bf16 %v1081_v38, %v1077_v37 }
 0x173   :  { %v502_v47 = vrot.slane %v494_v46, %v3609_v40  ;;  %651 = vmatmul.mubr.f32.vlgmr.msra.gmra.mrb[2].mxu0 %v494_v46  ;;  %722 = vmatmul.mubr.f32.vlgmr.msra.gmra.mrb[6].mxu1 %v494_v46  ;;  %v1076_v46 = vld [vmem:[#allocation7 + $0x100] sm:$0xff] }
 0x174   :  { %2703 = vmatpush1.bf16.msra.mxu0 %v3451_v13  ;;  %2735 = vmatpush1.bf16.msra.mxu1 %v3481_v1 }
 0x175   :  { %v503_v48 = vcombine.high %v502_v47, %v502_v47  ;;  %2465 = vst.sshfl [vmem:[#allocation2] sm:$0x1 pattern:$0x73625140] %v502_v47  ;;  %2705 = vmatprep.subr.bf16.mxu0 %v3454_v18  ;;  %2737 = vmatprep.subr.bf16.mxu1 %v3487_v3  ;;  %v1080_v47 = vld [vmem:[#allocation7 + $0x120] sm:$0xff] }
 0x176   :  { %911 = vmatprep.mubr.f32.mxu0 %v3356_v0  ;;  %982 = vmatprep.mubr.f32.mxu1 %v3356_v0 }
 0x177   :  { %2466 = vst.sshfl [vmem:[#allocation2 + $0x8] sm:$0x1 pattern:$0x73625140] %v503_v48  ;;  %v3697_v48 = vpack.c.bf16 %v1080_v47, %v1076_v46  ;;  %v1312_v47 = vld [vmem:[#allocation7 + $0x38] sm:$0xff] }
 0x178   :  { %2707 = vmatpush1.bf16.msra.mxu0 %v3458_v25  ;;  %2739 = vmatpush1.bf16.msra.mxu1 %v3495_v15 }
 0x179   :  { %2709 = vmatprep.subr.bf16.mxu0 %v3462_v31  ;;  %2741 = vmatprep.subr.bf16.mxu1 %v3502_v17 }
 0x17c   :  { %2711 = vmatpush1.bf16.msra.mxu0 %v3465_v39  ;;  %2743 = vmatpush1.bf16.msra.mxu1 %v3508_v29 }
 0x17d   :  { %2713 = vmatprep.subr.bf16.mxu0 %v3468_v44  ;;  %2745 = vmatprep.subr.bf16.mxu1 %v3514_v32 }
 0x180   :  { %2715 = vmatpush1.bf16.msra.mxu0 %v3474_v53  ;;  %2747 = vmatpush1.bf16.msra.mxu1 %v3520_v41 }
 0x181   :  { %2717 = vmatprep.subr.bf16.mxu0 %v3479_v58  ;;  %2749 = vmatprep.subr.bf16.mxu1 %v3526_v43 }
 0x184   :  { %2719 = vmatpush1.bf16.msra.mxu0 %v3485_v2  ;;  %2751 = vmatpush1.bf16.msra.mxu1 %v3530_v49 }
 0x185   :  { %2721 = vmatprep.subr.bf16.mxu0 %v3490_v7  ;;  %2753 = vmatprep.subr.bf16.mxu1 %v3534_v50 }
 0x188   :  { %2723 = vmatpush1.bf16.msra.mxu0 %v3500_v16  ;;  %2755 = vmatpush1.bf16.msra.mxu1 %v3539_v57 }
 0x189   :  { %2725 = vmatprep.subr.bf16.mxu0 %v3505_v22  ;;  %2757 = vmatprep.subr.bf16.mxu1 %v3542_v59 }
 0x18c   :  { %2727 = vmatpush1.bf16.msra.mxu0 %v3512_v30  ;;  %2759 = vmatpush1.bf16.msra.mxu1 %v3548_v4 }
 0x18d   :  { %2729 = vmatprep.subr.bf16.mxu0 %v3517_v36  ;;  %2761 = vmatprep.subr.bf16.mxu1 %v3551_v5 }
 0x190   :  { %2731 = vmatpush1.bf16.msra.mxu0 %v3524_v42  ;;  %2763 = vmatpush1.bf16.msra.mxu1 %v3556_v10 }
 0x191   :  { %2797 = vmatprep.subr.bf16.mxu1 %v3476_v54 }
 0x246   :  { %v652_v13 = vpop.f32.mrb[2].mxu0  ;;  %v723_v18 = vpop.f32.mrb[6].mxu1 }
 0x247   :  { %v728_v25 = vadd.f32 %v652_v13, %v3594_v28  ;;  %v654_v31 = vpop.f32.mrb[3].mxu0  ;;  %v725_v39 = vpop.f32.mrb[7].mxu1  ;;  %v730_v2 = vadd.f32 %v723_v18, %v3600_v52  ;;  %v1085_v13 = vld [vmem:[#allocation7 + $0x148] sm:$0xff] }
 0x248   :  { %v729_v44 = vadd.f32 %v654_v31, %v3596_v33  ;;  %v731_v7 = vadd.f32 %v725_v39, %v3602_v56  ;;  %v1089_v18 = vld [vmem:[#allocation7 + $0x168] sm:$0xff]  ;;  %v1084_v31 = vld [vmem:[#allocation7 + $0x140] sm:$0xff] }
 0x249   :  { %v2467_v53 = vmul.f32 -1.442695, %v728_v25  ;;  %v2469_v16 = vmul.f32 -1.442695, %v730_v2  ;;  %v3701_v25 = vpack.c.bf16 %v1089_v18, %v1085_v13  ;;  %v1088_v39 = vld [vmem:[#allocation7 + $0x160] sm:$0xff]  ;;  %v1307_v18 = vld [vmem:[#allocation7 + $0x10] sm:$0xff] }
 0x24a   :  { %v2468_v58 = vmul.f32 -1.442695, %v729_v44  ;;  %v3703_v44 = vpack.c.bf16 %v1088_v39, %v1084_v31  ;;  %v1092_v2 = vld [vmem:[#allocation7 + $0x180] sm:$0xff]  ;;  %v1311_v31 = vld [vmem:[#allocation7 + $0x30] sm:$0xff] }
 0x24b   :  { %3142 = vpow2.f32 %v2467_v53  ;;  %v1093_v53 = vld [vmem:[#allocation7 + $0x188] sm:$0xff]  ;;  %v3749_v39 = vpack.c.bf16 %v1311_v31, %v1307_v18 }
 0x24c   :  { %3144 = vpow2.f32 %v2468_v58  ;;  %v1097_v58 = vld [vmem:[#allocation7 + $0x1a8] sm:$0xff] }
 0x24d   :  { %3146 = vtanh.f32 %v731_v7  ;;  %v3706_v7 = vpack.c.bf16 %v1097_v58, %v1093_v53  ;;  %v1316_v53 = vld [vmem:[#allocation7 + $0x58] sm:$0xff] }
 0x24e   :  { %3148 = vpow2.f32 %v2469_v16  ;;  %v1096_v16 = vld [vmem:[#allocation7 + $0x1a0] sm:$0xff]  ;;  %v1320_v58 = vld [vmem:[#allocation7 + $0x78] sm:$0xff] }
 0x255   :  { %v3143_v22 = vpop.eup %3142 }
 0x256   :  { %v741_v30 = vadd.f32 1.0, %v3143_v22  ;;  %v3145_v54 = vpop.eup %3144  ;;  %v1101_v22 = vld [vmem:[#allocation7 + $0x1c8] sm:$0xff] }
 0x257   :  { %v742_v36 = vadd.f32 1.0, %v3145_v54  ;;  %v3147_v42 = vpop.eup %3146  ;;  %v3709_v54 = vpack.c.bf16 %v1096_v16, %v1092_v2  ;;  %v3753_v2 = vpack.c.bf16 %v1320_v58, %v1316_v53  ;;  %v1315_v16 = vld [vmem:[#allocation7 + $0x50] sm:$0xff] }
 0x258   :  { %3150 = vrcp.f32 %v741_v30  ;;  %v3149_v20 = vpop.eup %3148  ;;  %v1105_v30 = vld [vmem:[#allocation7 + $0x1e8] sm:$0xff]  ;;  %v1363_v53 = vld [vmem:[#allocation7 + $0x1d0] sm:$0xff] }
 0x259   :  { %3152 = vrcp.f32 %v742_v36  ;;  %v743_v61 = vadd.f32 1.0, %v3149_v20  ;;  %v3712_v36 = vpack.c.bf16 %v1105_v30, %v1101_v22  ;;  %v1104_v20 = vld [vmem:[#allocation7 + $0x1e0] sm:$0xff]  ;;  %v1319_v22 = vld [vmem:[#allocation7 + $0x70] sm:$0xff] }
 0x25a   :  { %v3755_v30 = vpack.c.bf16 %v1319_v22, %v1315_v16  ;;  %v1367_v58 = vld [vmem:[#allocation7 + $0x1f0] sm:$0xff] }
 0x25b   :  { %3154 = vrcp.f32 %v743_v61  ;;  %v3791_v16 = vpack.c.bf16 %v1367_v58, %v1363_v53 }
 0x262   :  { %v3151_v51 = vpop.eup %3150 }
 0x263   :  { %v752_v55 = vmul.f32 %v3151_v51, %v3147_v42  ;;  %v3153_v60 = vpop.eup %3152  ;;  %v1100_v42 = vld [vmem:[#allocation7 + $0x1c0] sm:$0xff] }
 0x264   :  { %v751_v62 = vmul.f32 %v3153_v60, %v3606_v27  ;;  %v1068_v27 = vld [vmem:[#allocation7 + $0xc0] sm:$0xff]  ;;  %v3715_v51 = vpack.c.bf16 %v1104_v20, %v1100_v42  ;;  %v1324_v42 = vld [vmem:[#allocation7 + $0x98] sm:$0xff] }
 0x265   :  { %v3155_v6 = vpop.eup %3154  ;;  %v3691_v35 = vpack.c.bf16 %v1072_v34, %v1068_v27  ;;  %v1328_v20 = vld [vmem:[#allocation7 + $0xb8] sm:$0xff] }
 0x266   :  { %v3650_v63 = vadd.f32 %v752_v55, %v751_v62 }
 0x268   :  { %3156 = vtanh.f32 %v3650_v63 }
 0x272   :  { %v3157_v9 = vpop.eup %3156 }
 0x273   :  { %v755_v11 = vmul.f32 %v3157_v9, %v3155_v6 }
 0x275   :  { %v763_v12 = vrot.slane %v755_v11, %v3609_v40  ;;  %912 = vmatmul.mubr.f32.vlgmr.msra.gmra.mrb[4].mxu0 %v755_v11  ;;  %983 = vmatmul.mubr.f32.vlgmr.msra.gmra.mrb[8].mxu1 %v755_v11 }
 0x276   :  { %2799 = vmatpush1.bf16.msra.mxu1 %v3481_v1  ;;  %1172 = vmatprep.mubr.f32.mxu0 %v3356_v0  ;;  %v1045_v1 = vld [vmem:[#allocation7 + $0x8] sm:$0xff] }
 0x277   :  { %v764_v14 = vcombine.high %v763_v12, %v763_v12  ;;  %2470 = vst.sshfl [vmem:[#allocation2 + $0x1] sm:$0x1 pattern:$0x73625140] %v763_v12  ;;  %2801 = vmatprep.subr.bf16.mxu1 %v3487_v3  ;;  %1243 = vmatprep.mubr.f32.mxu1 %v3356_v0  ;;  %v1049_v3 = vld [vmem:[#allocation7 + $0x28] sm:$0xff] }
 0x279   :  { %2471 = vst.sshfl [vmem:[#allocation2 + $0x9] sm:$0x1 pattern:$0x73625140] %v764_v14 }
 0x27a   :  { %2803 = vmatpush1.bf16.msra.mxu1 %v3495_v15  ;;  %v3671_v15 = vpack.c.bf16 %v1049_v3, %v1045_v1 }
 0x27b   :  { %2805 = vmatprep.subr.bf16.mxu1 %v3502_v17  ;;  %v1044_v17 = vld [vmem:[#allocation7] sm:$0xff] }
 0x27c   :  { %2765 = vmatprep.subr.bf16.mxu0 %v3671_v15 }
 0x27e   :  { %2807 = vmatpush1.bf16.msra.mxu1 %v3508_v29  ;;  %v1048_v29 = vld [vmem:[#allocation7 + $0x20] sm:$0xff] }
 0x27f   :  { %2809 = vmatprep.subr.bf16.mxu1 %v3514_v32  ;;  %v3673_v32 = vpack.c.bf16 %v1048_v29, %v1044_v17 }
 0x281   :  { %2767 = vmatpush1.bf16.msra.mxu0 %v3673_v32 }
 0x282   :  { %2811 = vmatpush1.bf16.msra.mxu1 %v3520_v41  ;;  %v1053_v41 = vld [vmem:[#allocation7 + $0x48] sm:$0xff] }
 0x283   :  { %2813 = vmatprep.subr.bf16.mxu1 %v3526_v43  ;;  %v1057_v43 = vld [vmem:[#allocation7 + $0x68] sm:$0xff] }
 0x286   :  { %2815 = vmatpush1.bf16.msra.mxu1 %v3530_v49  ;;  %v3677_v49 = vpack.c.bf16 %v1057_v43, %v1053_v41 }
 0x287   :  { %2817 = vmatprep.subr.bf16.mxu1 %v3534_v50  ;;  %v1052_v50 = vld [vmem:[#allocation7 + $0x40] sm:$0xff] }
 0x288   :  { %2769 = vmatprep.subr.bf16.mxu0 %v3677_v49 }
 0x28a   :  { %2819 = vmatpush1.bf16.msra.mxu1 %v3539_v57  ;;  %v1056_v57 = vld [vmem:[#allocation7 + $0x60] sm:$0xff] }
 0x28b   :  { %2821 = vmatprep.subr.bf16.mxu1 %v3542_v59  ;;  %v3679_v59 = vpack.c.bf16 %v1056_v57, %v1052_v50 }
 0x28d   :  { %2771 = vmatpush1.bf16.msra.mxu0 %v3679_v59 }
 0x28e   :  { %2823 = vmatpush1.bf16.msra.mxu1 %v3548_v4  ;;  %v1061_v4 = vld [vmem:[#allocation7 + $0x88] sm:$0xff] }
 0x28f   :  { %2825 = vmatprep.subr.bf16.mxu1 %v3551_v5  ;;  %v1065_v5 = vld [vmem:[#allocation7 + $0xa8] sm:$0xff] }
 0x292   :  { %2827 = vmatpush1.bf16.msra.mxu1 %v3556_v10  ;;  %v3683_v10 = vpack.c.bf16 %v1065_v5, %v1061_v4 }
 0x294   :  { %2773 = vmatprep.subr.bf16.mxu0 %v3683_v10 }
 0x295   :  { %2775 = vmatpush1.bf16.msra.mxu0 %v3685_v23 }
 0x296   :  { %2777 = vmatprep.subr.bf16.mxu0 %v3689_v26 }
 0x299   :  { %2779 = vmatpush1.bf16.msra.mxu0 %v3691_v35 }
 0x29a   :  { %2781 = vmatprep.subr.bf16.mxu0 %v3695_v45 }
 0x29d   :  { %2783 = vmatpush1.bf16.msra.mxu0 %v3697_v48 }
 0x29e   :  { %2785 = vmatprep.subr.bf16.mxu0 %v3701_v25 }
 0x2a1   :  { %2787 = vmatpush1.bf16.msra.mxu0 %v3703_v44 }
 0x2a2   :  { %2789 = vmatprep.subr.bf16.mxu0 %v3706_v7 }
 0x2a5   :  { %2791 = vmatpush1.bf16.msra.mxu0 %v3709_v54 }
 0x2a6   :  { %2793 = vmatprep.subr.bf16.mxu0 %v3712_v36 }
 0x2a9   :  { %2795 = vmatpush1.bf16.msra.mxu0 %v3715_v51 }
 0x2aa   :  { %2829 = vmatprep.subr.bf16.mxu0 %v3671_v15 }
 0x348   :  { %v913_v55 = vpop.f32.mrb[4].mxu0  ;;  %v984_v60 = vpop.f32.mrb[8].mxu1 }
 0x349   :  { %v989_v61 = vadd.f32 %v913_v55, %v3594_v28  ;;  %v915_v62 = vpop.f32.mrb[5].mxu0  ;;  %v986_v6 = vpop.f32.mrb[9].mxu1  ;;  %v991_v14 = vadd.f32 %v984_v60, %v3600_v52  ;;  %v3759_v55 = vpack.c.bf16 %v1328_v20, %v1324_v42  ;;  %v1323_v60 = vld [vmem:[#allocation7 + $0x90] sm:$0xff] }
 0x34a   :  { %v990_v9 = vadd.f32 %v915_v62, %v3596_v33  ;;  %v992_v1 = vadd.f32 %v986_v6, %v3602_v56  ;;  %v1332_v6 = vld [vmem:[#allocation7 + $0xd8] sm:$0xff] }
 0x34b   :  { %v2472_v11 = vmul.f32 -1.442695, %v989_v61  ;;  %v2474_v3 = vmul.f32 -1.442695, %v991_v14  ;;  %v1327_v61 = vld [vmem:[#allocation7 + $0xb0] sm:$0xff] }
 0x34c   :  { %v2473_v12 = vmul.f32 -1.442695, %v990_v9  ;;  %v3761_v62 = vpack.c.bf16 %v1327_v61, %v1323_v60  ;;  %v1336_v9 = vld [vmem:[#allocation7 + $0xf8] sm:$0xff]  ;;  %v1335_v14 = vld [vmem:[#allocation7 + $0xf0] sm:$0xff] }
 0x34d   :  { %3158 = vpow2.f32 %v2472_v11  ;;  %v3765_v11 = vpack.c.bf16 %v1336_v9, %v1332_v6 }
 0x34e   :  { %3160 = vpow2.f32 %v2473_v12  ;;  %v1331_v12 = vld [vmem:[#allocation7 + $0xd0] sm:$0xff] }
 0x34f   :  { %3162 = vtanh.f32 %v992_v1  ;;  %v3767_v1 = vpack.c.bf16 %v1335_v14, %v1331_v12 }
 0x350   :  { %3164 = vpow2.f32 %v2474_v3  ;;  %v1340_v3 = vld [vmem:[#allocation7 + $0x118] sm:$0xff] }
 0x357   :  { %v3159_v17 = vpop.eup %3158 }
 0x358   :  { %v1002_v29 = vadd.f32 1.0, %v3159_v17  ;;  %v3161_v41 = vpop.eup %3160  ;;  %v1344_v17 = vld [vmem:[#allocation7 + $0x138] sm:$0xff] }
 0x359   :  { %v1003_v43 = vadd.f32 1.0, %v3161_v41  ;;  %v3163_v50 = vpop.eup %3162  ;;  %v1339_v41 = vld [vmem:[#allocation7 + $0x110] sm:$0xff] }
 0x35a   :  { %3166 = vrcp.f32 %v1002_v29  ;;  %v3165_v57 = vpop.eup %3164  ;;  %v3771_v29 = vpack.c.bf16 %v1344_v17, %v1340_v3 }
 0x35b   :  { %3168 = vrcp.f32 %v1003_v43  ;;  %v1004_v21 = vadd.f32 1.0, %v3165_v57  ;;  %v1343_v43 = vld [vmem:[#allocation7 + $0x130] sm:$0xff]  ;;  %v1348_v57 = vld [vmem:[#allocation7 + $0x158] sm:$0xff] }
 0x35d   :  { %3170 = vrcp.f32 %v1004_v21  ;;  %v1351_v21 = vld [vmem:[#allocation7 + $0x170] sm:$0xff] }
 0x364   :  { %v3167_v4 = vpop.eup %3166 }
 0x365   :  { %v1013_v5 = vmul.f32 %v3167_v4, %v3163_v50  ;;  %v3169_v8 = vpop.eup %3168  ;;  %v3773_v50 = vpack.c.bf16 %v1343_v43, %v1339_v41  ;;  %v1352_v4 = vld [vmem:[#allocation7 + $0x178] sm:$0xff] }
 0x366   :  { %v1012_v19 = vmul.f32 %v3169_v8, %v3650_v63  ;;  %v1308_v63 = vld [vmem:[#allocation7 + $0x18] sm:$0xff]  ;;  %v1347_v8 = vld [vmem:[#allocation7 + $0x150] sm:$0xff] }
 0x367   :  { %v3171_v27 = vpop.eup %3170  ;;  %v3747_v13 = vpack.c.bf16 %v1312_v47, %v1308_v63  ;;  %v1364_v63 = vld [vmem:[#allocation7 + $0x1d8] sm:$0xff] }
 0x368   :  { %v3725_v24 = vadd.f32 %v1013_v5, %v1012_v19  ;;  %v3777_v5 = vpack.c.bf16 %v1352_v4, %v1348_v57  ;;  %v3779_v19 = vpack.c.bf16 %v1351_v21, %v1347_v8  ;;  %v1368_v47 = vld [vmem:[#allocation7 + $0x1f8] sm:$0xff] }
 0x369   :  { %2861 = vmatprep.subr.bf16.mxu1 %v3747_v13  ;;  %v3788_v31 = vpack.c.bf16 %v1368_v47, %v1364_v63 }
 0x36a   :  { %3172 = vtanh.f32 %v3725_v24 }
 0x374   :  { %v3173_v34 = vpop.eup %3172 }
 0x375   :  { %v1016_v37 = vmul.f32 %v3173_v34, %v3171_v27  ;;  %v1356_v27 = vld [vmem:[#allocation7 + $0x198] sm:$0xff] }
 0x376   :  { %v1360_v34 = vld [vmem:[#allocation7 + $0x1b8] sm:$0xff] }
 0x377   :  { %v1024_v38 = vrot.slane %v1016_v37, %v3609_v40  ;;  %1173 = vmatmul.mubr.f32.vlgmr.msra.gmra.mrb[6].mxu0 %v1016_v37  ;;  %1244 = vmatmul.mubr.f32.vlgmr.msra.gmra.mrb[10].mxu1 %v1016_v37  ;;  %v1355_v37 = vld [vmem:[#allocation7 + $0x190] sm:$0xff] }
 0x378   :  { %2831 = vmatpush1.bf16.msra.mxu0 %v3673_v32  ;;  %1433 = vmatprep.mubr.f32.mxu0 %v3356_v0 }
 0x379   :  { %v1025_v46 = vcombine.high %v1024_v38, %v1024_v38  ;;  %2475 = vst.sshfl [vmem:[#allocation2 + $0x2] sm:$0x1 pattern:$0x73625140] %v1024_v38  ;;  %2833 = vmatprep.subr.bf16.mxu0 %v3677_v49  ;;  %1504 = vmatprep.mubr.f32.mxu1 %v3356_v0  ;;  %v3782_v38 = vpack.c.bf16 %v1360_v34, %v1356_v27 }
 0x37a   :  { %2863 = vmatpush1.bf16.msra.mxu1 %v3749_v39 }
 0x37b   :  { %2476 = vst.sshfl [vmem:[#allocation2 + $0xa] sm:$0x1 pattern:$0x73625140] %v1025_v46  ;;  %2865 = vmatprep.subr.bf16.mxu1 %v3753_v2  ;;  %v1359_v46 = vld [vmem:[#allocation7 + $0x1b0] sm:$0xff] }
 0x37c   :  { %2835 = vmatpush1.bf16.msra.mxu0 %v3679_v59  ;;  %v3785_v18 = vpack.c.bf16 %v1359_v46, %v1355_v37 }
 0x37d   :  { %2837 = vmatprep.subr.bf16.mxu0 %v3683_v10 }
 0x37e   :  { %2867 = vmatpush1.bf16.msra.mxu1 %v3755_v30 }
 0x37f   :  { %2869 = vmatprep.subr.bf16.mxu1 %v3759_v55 }
 0x380   :  { %2839 = vmatpush1.bf16.msra.mxu0 %v3685_v23 }
 0x381   :  { %2841 = vmatprep.subr.bf16.mxu0 %v3689_v26 }
 0x382   :  { %2871 = vmatpush1.bf16.msra.mxu1 %v3761_v62 }
 0x383   :  { %2873 = vmatprep.subr.bf16.mxu1 %v3765_v11 }
 0x384   :  { %2843 = vmatpush1.bf16.msra.mxu0 %v3691_v35 }
 0x385   :  { %2845 = vmatprep.subr.bf16.mxu0 %v3695_v45 }
 0x386   :  { %2875 = vmatpush1.bf16.msra.mxu1 %v3767_v1 }
 0x387   :  { %2877 = vmatprep.subr.bf16.mxu1 %v3771_v29 }
 0x388   :  { %2847 = vmatpush1.bf16.msra.mxu0 %v3697_v48 }
 0x389   :  { %2849 = vmatprep.subr.bf16.mxu0 %v3701_v25 }
 0x38a   :  { %2879 = vmatpush1.bf16.msra.mxu1 %v3773_v50 }
 0x38b   :  { %2881 = vmatprep.subr.bf16.mxu1 %v3777_v5 }
 0x38c   :  { %2851 = vmatpush1.bf16.msra.mxu0 %v3703_v44 }
 0x38d   :  { %2853 = vmatprep.subr.bf16.mxu0 %v3706_v7 }
 0x38e   :  { %2883 = vmatpush1.bf16.msra.mxu1 %v3779_v19 }
 0x38f   :  { %2885 = vmatprep.subr.bf16.mxu1 %v3782_v38 }
 0x390   :  { %2855 = vmatpush1.bf16.msra.mxu0 %v3709_v54 }
 0x391   :  { %2857 = vmatprep.subr.bf16.mxu0 %v3712_v36 }
 0x392   :  { %2887 = vmatpush1.bf16.msra.mxu1 %v3785_v18 }
 0x393   :  { %2889 = vmatprep.subr.bf16.mxu1 %v3788_v31 }
 0x394   :  { %2859 = vmatpush1.bf16.msra.mxu0 %v3715_v51 }
 0x395   :  { %2893 = vmatprep.subr.bf16.mxu0 %v3671_v15 }
 0x396   :  { %2891 = vmatpush1.bf16.msra.mxu1 %v3791_v16 }
 0x397   :  { %2925 = vmatprep.subr.bf16.mxu1 %v3747_v13 }
 0x44a   :  { %v1174_v22 = vpop.f32.mrb[6].mxu0  ;;  %v1245_v42 = vpop.f32.mrb[10].mxu1 }
 0x44b   :  { %v1250_v20 = vadd.f32 %v1174_v22, %v3594_v28  ;;  %v1176_v60 = vpop.f32.mrb[7].mxu0  ;;  %v1247_v61 = vpop.f32.mrb[11].mxu1  ;;  %v1252_v14 = vadd.f32 %v1245_v42, %v3600_v52 }
 0x44c   :  { %v1251_v6 = vadd.f32 %v1176_v60, %v3596_v33  ;;  %v1253_v3 = vadd.f32 %v1247_v61, %v3602_v56 }
 0x44d   :  { %v2477_v9 = vmul.f32 -1.442695, %v1250_v20  ;;  %v2479_v17 = vmul.f32 -1.442695, %v1252_v14 }
 0x44e   :  { %v2478_v12 = vmul.f32 -1.442695, %v1251_v6 }
 0x44f   :  { %3174 = vpow2.f32 %v2477_v9 }
 0x450   :  { %3176 = vpow2.f32 %v2478_v12 }
 0x451   :  { %3178 = vtanh.f32 %v1253_v3 }
 0x452   :  { %3180 = vpow2.f32 %v2479_v17 }
 0x459   :  { %v3175_v41 = vpop.eup %3174 }
 0x45a   :  { %v1263_v43 = vadd.f32 1.0, %v3175_v41  ;;  %v3177_v57 = vpop.eup %3176 }
 0x45b   :  { %v1264_v4 = vadd.f32 1.0, %v3177_v57  ;;  %v3179_v8 = vpop.eup %3178 }
 0x45c   :  { %3182 = vrcp.f32 %v1263_v43  ;;  %v3181_v21 = vpop.eup %3180 }
 0x45d   :  { %3184 = vrcp.f32 %v1264_v4  ;;  %v1265_v46 = vadd.f32 1.0, %v3181_v21 }
 0x45f   :  { %3186 = vrcp.f32 %v1265_v46 }
 0x466   :  { %v3183_v27 = vpop.eup %3182 }
 0x467   :  { %v1274_v34 = vmul.f32 %v3183_v27, %v3179_v8  ;;  %v3185_v37 = vpop.eup %3184 }
 0x468   :  { %v1273_v63 = vmul.f32 %v3185_v37, %v3725_v24 }
 0x469   :  { %v3187_v53 = vpop.eup %3186 }
 0x46a   :  { %v3801_v47 = vadd.f32 %v1274_v34, %v1273_v63 }
 0x46c   :  { %3188 = vtanh.f32 %v3801_v47 }
 0x476   :  { %v3189_v58 = vpop.eup %3188 }
 0x477   :  { %v1277_v22 = vmul.f32 %v3189_v58, %v3187_v53 }
 0x479   :  { %v1285_v42 = vrot.slane %v1277_v22, %v3609_v40  ;;  %1434 = vmatmul.mubr.f32.vlgmr.msra.gmra.mrb[8].mxu0 %v1277_v22  ;;  %1505 = vmatmul.mubr.f32.vlgmr.msra.gmra.mrb[12].mxu1 %v1277_v22 }
 0x47a   :  { %2895 = vmatpush1.bf16.msra.mxu0 %v3673_v32  ;;  %2927 = vmatpush1.bf16.msra.mxu1 %v3749_v39 }
 0x47b   :  { %v1286_v20 = vcombine.high %v1285_v42, %v1285_v42  ;;  %2480 = vst.sshfl [vmem:[#allocation2 + $0x3] sm:$0x1 pattern:$0x73625140] %v1285_v42  ;;  %2897 = vmatprep.subr.bf16.mxu0 %v3677_v49  ;;  %2929 = vmatprep.subr.bf16.mxu1 %v3753_v2 }
 0x47c   :  { %1694 = vmatprep.mubr.f32.mxu0 %v3356_v0  ;;  %1765 = vmatprep.mubr.f32.mxu1 %v3356_v0 }
 0x47d   :  { %2481 = vst.sshfl [vmem:[#allocation2 + $0xb] sm:$0x1 pattern:$0x73625140] %v1286_v20 }
 0x47e   :  { %2899 = vmatpush1.bf16.msra.mxu0 %v3679_v59  ;;  %2931 = vmatpush1.bf16.msra.mxu1 %v3755_v30 }
 0x47f   :  { %2901 = vmatprep.subr.bf16.mxu0 %v3683_v10  ;;  %2933 = vmatprep.subr.bf16.mxu1 %v3759_v55 }
 0x482   :  { %2903 = vmatpush1.bf16.msra.mxu0 %v3685_v23  ;;  %2935 = vmatpush1.bf16.msra.mxu1 %v3761_v62 }
 0x483   :  { %2905 = vmatprep.subr.bf16.mxu0 %v3689_v26  ;;  %2937 = vmatprep.subr.bf16.mxu1 %v3765_v11 }
 0x486   :  { %2907 = vmatpush1.bf16.msra.mxu0 %v3691_v35  ;;  %2939 = vmatpush1.bf16.msra.mxu1 %v3767_v1 }
 0x487   :  { %2909 = vmatprep.subr.bf16.mxu0 %v3695_v45  ;;  %2941 = vmatprep.subr.bf16.mxu1 %v3771_v29 }
 0x48a   :  { %2911 = vmatpush1.bf16.msra.mxu0 %v3697_v48  ;;  %2943 = vmatpush1.bf16.msra.mxu1 %v3773_v50 }
 0x48b   :  { %2913 = vmatprep.subr.bf16.mxu0 %v3701_v25  ;;  %2945 = vmatprep.subr.bf16.mxu1 %v3777_v5 }
 0x48e   :  { %2915 = vmatpush1.bf16.msra.mxu0 %v3703_v44  ;;  %2947 = vmatpush1.bf16.msra.mxu1 %v3779_v19 }
 0x48f   :  { %2917 = vmatprep.subr.bf16.mxu0 %v3706_v7  ;;  %2949 = vmatprep.subr.bf16.mxu1 %v3782_v38 }
 0x492   :  { %2919 = vmatpush1.bf16.msra.mxu0 %v3709_v54  ;;  %2951 = vmatpush1.bf16.msra.mxu1 %v3785_v18 }
 0x493   :  { %2921 = vmatprep.subr.bf16.mxu0 %v3712_v36  ;;  %2953 = vmatprep.subr.bf16.mxu1 %v3788_v31 }
 0x496   :  { %2923 = vmatpush1.bf16.msra.mxu0 %v3715_v51  ;;  %2955 = vmatpush1.bf16.msra.mxu1 %v3791_v16 }
 0x497   :  { %2957 = vmatprep.subr.bf16.mxu0 %v3671_v15  ;;  %2989 = vmatprep.subr.bf16.mxu1 %v3747_v13 }
 0x54c   :  { %v1435_v24 = vpop.f32.mrb[8].mxu0  ;;  %v1506_v60 = vpop.f32.mrb[12].mxu1 }
 0x54d   :  { %v1511_v61 = vadd.f32 %v1435_v24, %v3594_v28  ;;  %v1437_v6 = vpop.f32.mrb[9].mxu0  ;;  %v1508_v9 = vpop.f32.mrb[13].mxu1  ;;  %v1513_v17 = vadd.f32 %v1506_v60, %v3600_v52 }
 0x54e   :  { %v1512_v12 = vadd.f32 %v1437_v6, %v3596_v33  ;;  %v1514_v41 = vadd.f32 %v1508_v9, %v3602_v56 }
 0x54f   :  { %v2482_v14 = vmul.f32 -1.442695, %v1511_v61  ;;  %v2484_v43 = vmul.f32 -1.442695, %v1513_v17 }
 0x550   :  { %v2483_v3 = vmul.f32 -1.442695, %v1512_v12 }
 0x551   :  { %3190 = vpow2.f32 %v2482_v14 }
 0x552   :  { %3192 = vpow2.f32 %v2483_v3 }
 0x553   :  { %3194 = vtanh.f32 %v1514_v41 }
 0x554   :  { %3196 = vpow2.f32 %v2484_v43 }
 0x55b   :  { %v3191_v15 = vpop.eup %3190 }
 0x55c   :  { %v1524_v57 = vadd.f32 1.0, %v3191_v15  ;;  %v3193_v4 = vpop.eup %3192 }
 0x55d   :  { %v1525_v8 = vadd.f32 1.0, %v3193_v4  ;;  %v3195_v21 = vpop.eup %3194  ;;  %v2108_v4 = vld [vmem:[#allocation7 + $0xa0] sm:$0xff] }
 0x55e   :  { %3198 = vrcp.f32 %v1524_v57  ;;  %v3197_v27 = vpop.eup %3196 }
 0x55f   :  { %3200 = vrcp.f32 %v1525_v8  ;;  %v1526_v63 = vadd.f32 1.0, %v3197_v27  ;;  %v2117_v27 = vld [vmem:[#allocation7 + $0xe8] sm:$0xff] }
 0x561   :  { %3202 = vrcp.f32 %v1526_v63 }
 0x568   :  { %v3199_v34 = vpop.eup %3198 }
 0x569   :  { %v1535_v37 = vmul.f32 %v3199_v34, %v3195_v21  ;;  %v3201_v46 = vpop.eup %3200  ;;  %v2113_v21 = vld [vmem:[#allocation7 + $0xc8] sm:$0xff] }
 0x56a   :  { %v1534_v53 = vmul.f32 %v3201_v46, %v3801_v47  ;;  %v3032_v34 = vpack.c.bf16 %v2117_v27, %v2113_v21  ;;  %v2116_v46 = vld [vmem:[#allocation7 + $0xe0] sm:$0xff]  ;;  %v2354_v27 = vld [vmem:[#allocation8 + $0x8] sm:$0xff] }
 0x56b   :  { %v3203_v22 = vpop.eup %3202  ;;  %v2353_v21 = vld [vmem:[#allocation8] sm:$0xff] }
 0x56c   :  { %v3844_v58 = vadd.f32 %v1535_v37, %v1534_v53  ;;  %v2112_v37 = vld [vmem:[#allocation7 + $0xc0] sm:$0xff]  ;;  %v2121_v53 = vld [vmem:[#allocation7 + $0x108] sm:$0xff] }
 0x56d   :  { %v3034_v63 = vpack.c.bf16 %v2116_v46, %v2112_v37  ;;  %v2356_v37 = vld [vmem:[#allocation8 + $0x18] sm:$0xff] }
 0x56e   :  { %3204 = vtanh.f32 %v3844_v58 }
 0x578   :  { %v3205_v42 = vpop.eup %3204 }
 0x579   :  { %v1538_v20 = vmul.f32 %v3205_v42, %v3203_v22  ;;  %v2120_v42 = vld [vmem:[#allocation7 + $0x100] sm:$0xff] }
 0x57b   :  { %v1546_v24 = vrot.slane %v1538_v20, %v3609_v40  ;;  %1695 = vmatmul.mubr.f32.vlgmr.msra.gmra.mrb[10].mxu0 %v1538_v20  ;;  %1766 = vmatmul.mubr.f32.vlgmr.msra.gmra.mrb[14].mxu1 %v1538_v20  ;;  %v2124_v20 = vld [vmem:[#allocation7 + $0x120] sm:$0xff] }
 0x57c   :  { %2959 = vmatpush1.bf16.msra.mxu0 %v3673_v32  ;;  %2991 = vmatpush1.bf16.msra.mxu1 %v3749_v39 }
 0x57d   :  { %v1547_v60 = vcombine.high %v1546_v24, %v1546_v24  ;;  %2485 = vst.sshfl [vmem:[#allocation2 + $0x4] sm:$0x1 pattern:$0x73625140] %v1546_v24  ;;  %2961 = vmatprep.subr.bf16.mxu0 %v3677_v49  ;;  %2993 = vmatprep.subr.bf16.mxu1 %v3753_v2  ;;  %v3038_v24 = vpack.c.bf16 %v2124_v20, %v2120_v42  ;;  %v2360_v42 = vld [vmem:[#allocation8 + $0x38] sm:$0xff] }
 0x57e   :  { %1955 = vmatprep.mubr.f32.mxu0 %v3356_v0  ;;  %2026 = vmatprep.mubr.f32.mxu1 %v3356_v0 }
 0x57f   :  { %2486 = vst.sshfl [vmem:[#allocation2 + $0xc] sm:$0x1 pattern:$0x73625140] %v1547_v60  ;;  %v2129_v60 = vld [vmem:[#allocation7 + $0x148] sm:$0xff] }
 0x580   :  { %2963 = vmatpush1.bf16.msra.mxu0 %v3679_v59  ;;  %2995 = vmatpush1.bf16.msra.mxu1 %v3755_v30 }
 0x581   :  { %2965 = vmatprep.subr.bf16.mxu0 %v3683_v10  ;;  %2997 = vmatprep.subr.bf16.mxu1 %v3759_v55 }
 0x584   :  { %2967 = vmatpush1.bf16.msra.mxu0 %v3685_v23  ;;  %2999 = vmatpush1.bf16.msra.mxu1 %v3761_v62 }
 0x585   :  { %2969 = vmatprep.subr.bf16.mxu0 %v3689_v26  ;;  %3001 = vmatprep.subr.bf16.mxu1 %v3765_v11 }
 0x588   :  { %2971 = vmatpush1.bf16.msra.mxu0 %v3691_v35  ;;  %3003 = vmatpush1.bf16.msra.mxu1 %v3767_v1 }
 0x589   :  { %2973 = vmatprep.subr.bf16.mxu0 %v3695_v45  ;;  %3005 = vmatprep.subr.bf16.mxu1 %v3771_v29 }
 0x58c   :  { %2975 = vmatpush1.bf16.msra.mxu0 %v3697_v48  ;;  %3007 = vmatpush1.bf16.msra.mxu1 %v3773_v50 }
 0x58d   :  { %2977 = vmatprep.subr.bf16.mxu0 %v3701_v25  ;;  %3009 = vmatprep.subr.bf16.mxu1 %v3777_v5 }
 0x590   :  { %2979 = vmatpush1.bf16.msra.mxu0 %v3703_v44  ;;  %3011 = vmatpush1.bf16.msra.mxu1 %v3779_v19 }
 0x591   :  { %2981 = vmatprep.subr.bf16.mxu0 %v3706_v7  ;;  %3013 = vmatprep.subr.bf16.mxu1 %v3782_v38 }
 0x594   :  { %2983 = vmatpush1.bf16.msra.mxu0 %v3709_v54  ;;  %3015 = vmatpush1.bf16.msra.mxu1 %v3785_v18 }
 0x595   :  { %2985 = vmatprep.subr.bf16.mxu0 %v3712_v36  ;;  %3017 = vmatprep.subr.bf16.mxu1 %v3788_v31 }
 0x598   :  { %2987 = vmatpush1.bf16.msra.mxu0 %v3715_v51  ;;  %3019 = vmatpush1.bf16.msra.mxu1 %v3791_v16 }
 0x599   :  { %3053 = vmatprep.subr.bf16.mxu1 %v3747_v13 }
 0x64e   :  { %v1696_v32 = vpop.f32.mrb[10].mxu0  ;;  %v1767_v49 = vpop.f32.mrb[14].mxu1 }
 0x64f   :  { %v1772_v59 = vadd.f32 %v1696_v32, %v3594_v28  ;;  %v1698_v10 = vpop.f32.mrb[11].mxu0  ;;  %v1769_v23 = vpop.f32.mrb[15].mxu1  ;;  %v1774_v48 = vadd.f32 %v1767_v49, %v3600_v52  ;;  %v2133_v32 = vld [vmem:[#allocation7 + $0x168] sm:$0xff] }
 0x650   :  { %v1773_v26 = vadd.f32 %v1698_v10, %v3596_v33  ;;  %v1775_v25 = vadd.f32 %v1769_v23, %v3602_v56  ;;  %v3040_v49 = vpack.c.bf16 %v2133_v32, %v2129_v60  ;;  %v2132_v10 = vld [vmem:[#allocation7 + $0x160] sm:$0xff]  ;;  %v2362_v60 = vld [vmem:[#allocation8 + $0x48] sm:$0xff] }
 0x651   :  { %v2487_v35 = vmul.f32 -1.442695, %v1772_v59  ;;  %v2489_v44 = vmul.f32 -1.442695, %v1774_v48  ;;  %v2128_v59 = vld [vmem:[#allocation7 + $0x140] sm:$0xff] }
 0x652   :  { %v2488_v45 = vmul.f32 -1.442695, %v1773_v26  ;;  %v3042_v23 = vpack.c.bf16 %v2132_v10, %v2128_v59  ;;  %v2137_v26 = vld [vmem:[#allocation7 + $0x188] sm:$0xff]  ;;  %v2364_v59 = vld [vmem:[#allocation8 + $0x58] sm:$0xff] }
 0x653   :  { %3206 = vpow2.f32 %v2487_v35  ;;  %v2141_v35 = vld [vmem:[#allocation7 + $0x1a8] sm:$0xff] }
 0x654   :  { %3208 = vpow2.f32 %v2488_v45  ;;  %v2136_v45 = vld [vmem:[#allocation7 + $0x180] sm:$0xff]  ;;  %v3044_v48 = vpack.c.bf16 %v2141_v35, %v2137_v26  ;;  %v2366_v26 = vld [vmem:[#allocation8 + $0x68] sm:$0xff] }
 0x655   :  { %3210 = vtanh.f32 %v1775_v25  ;;  %v2140_v25 = vld [vmem:[#allocation7 + $0x1a0] sm:$0xff] }
 0x656   :  { %3212 = vpow2.f32 %v2489_v44  ;;  %v2145_v44 = vld [vmem:[#allocation7 + $0x1c8] sm:$0xff] }
 0x65d   :  { %v3207_v7 = vpop.eup %3206 }
 0x65e   :  { %v1785_v54 = vadd.f32 1.0, %v3207_v7  ;;  %v3209_v36 = vpop.eup %3208  ;;  %v2149_v7 = vld [vmem:[#allocation7 + $0x1e8] sm:$0xff] }
 0x65f   :  { %v1786_v51 = vadd.f32 1.0, %v3209_v36  ;;  %v3211_v13 = vpop.eup %3210  ;;  %v3048_v36 = vpack.c.bf16 %v2149_v7, %v2145_v44 }
 0x660   :  { %3214 = vrcp.f32 %v1785_v54  ;;  %v3213_v47 = vpop.eup %3212  ;;  %v3046_v54 = vpack.c.bf16 %v2140_v25, %v2136_v45  ;;  %v2367_v45 = vld [vmem:[#allocation8 + $0x70] sm:$0xff] }
 0x661   :  { %3216 = vrcp.f32 %v1786_v51  ;;  %v1787_v12 = vadd.f32 1.0, %v3213_v47  ;;  %v2144_v51 = vld [vmem:[#allocation7 + $0x1c0] sm:$0xff] }
 0x663   :  { %3218 = vrcp.f32 %v1787_v12 }
 0x66a   :  { %v3215_v61 = vpop.eup %3214 }
 0x66b   :  { %v1796_v6 = vmul.f32 %v3215_v61, %v3211_v13  ;;  %v3217_v9 = vpop.eup %3216  ;;  %v2148_v13 = vld [vmem:[#allocation7 + $0x1e0] sm:$0xff] }
 0x66c   :  { %v1795_v14 = vmul.f32 %v3217_v9, %v3844_v58  ;;  %v2125_v58 = vld [vmem:[#allocation7 + $0x128] sm:$0xff]  ;;  %v3050_v47 = vpack.c.bf16 %v2148_v13, %v2144_v51 }
 0x66d   :  { %v3219_v17 = vpop.eup %3218  ;;  %v3036_v22 = vpack.c.bf16 %v2125_v58, %v2121_v53  ;;  %v2358_v53 = vld [vmem:[#allocation8 + $0x28] sm:$0xff] }
 0x66e   :  { %v3886_v3 = vadd.f32 %v1796_v6, %v1795_v14 }
 0x670   :  { %3220 = vtanh.f32 %v3886_v3 }
 0x67a   :  { %v3221_v41 = vpop.eup %3220 }
 0x67b   :  { %v1799_v43 = vmul.f32 %v3221_v41, %v3219_v17 }
 0x67d   :  { %v1807_v15 = vrot.slane %v1799_v43, %v3609_v40  ;;  %1956 = vmatmul.mubr.f32.vlgmr.msra.gmra.mrb[12].mxu0 %v1799_v43  ;;  %2027 = vmatmul.mubr.f32.vlgmr.msra.gmra.mrb[16].mxu1 %v1799_v43 }
 0x67e   :  { %3055 = vmatpush1.bf16.msra.mxu1 %v3749_v39  ;;  %2216 = vmatprep.mubr.f32.mxu0 %v3356_v0  ;;  %v2093_v39 = vld [vmem:[#allocation7 + $0x28] sm:$0xff] }
 0x67f   :  { %v1808_v57 = vcombine.high %v1807_v15, %v1807_v15  ;;  %2490 = vst.sshfl [vmem:[#allocation2 + $0x5] sm:$0x1 pattern:$0x73625140] %v1807_v15  ;;  %3057 = vmatprep.subr.bf16.mxu1 %v3753_v2  ;;  %2287 = vmatprep.mubr.f32.mxu1 %v3356_v0  ;;  %v2089_v0 = vld [vmem:[#allocation7 + $0x8] sm:$0xff] }
 0x680   :  { %v3020_v2 = vpack.c.bf16 %v2093_v39, %v2089_v0 }
 0x681   :  { %2491 = vst.sshfl [vmem:[#allocation2 + $0xd] sm:$0x1 pattern:$0x73625140] %v1808_v57 }
 0x682   :  { %3059 = vmatpush1.bf16.msra.mxu1 %v3755_v30  ;;  %v2088_v30 = vld [vmem:[#allocation7] sm:$0xff]  ;;  %3021 = vmatprep.subr.bf16.mxu0 %v3020_v2 }
 0x683   :  { %3061 = vmatprep.subr.bf16.mxu1 %v3759_v55  ;;  %v2092_v55 = vld [vmem:[#allocation7 + $0x20] sm:$0xff] }
 0x686   :  { %3063 = vmatpush1.bf16.msra.mxu1 %v3761_v62  ;;  %v3022_v62 = vpack.c.bf16 %v2092_v55, %v2088_v30 }
 0x687   :  { %3065 = vmatprep.subr.bf16.mxu1 %v3765_v11  ;;  %v2097_v11 = vld [vmem:[#allocation7 + $0x48] sm:$0xff] }
 0x688   :  { %3023 = vmatpush1.bf16.msra.mxu0 %v3022_v62 }
 0x68a   :  { %3067 = vmatpush1.bf16.msra.mxu1 %v3767_v1  ;;  %v2101_v1 = vld [vmem:[#allocation7 + $0x68] sm:$0xff] }
 0x68b   :  { %3069 = vmatprep.subr.bf16.mxu1 %v3771_v29  ;;  %v3024_v29 = vpack.c.bf16 %v2101_v1, %v2097_v11 }
 0x68d   :  { %3025 = vmatprep.subr.bf16.mxu0 %v3024_v29 }
 0x68e   :  { %3071 = vmatpush1.bf16.msra.mxu1 %v3773_v50  ;;  %v2096_v50 = vld [vmem:[#allocation7 + $0x40] sm:$0xff] }
 0x68f   :  { %3073 = vmatprep.subr.bf16.mxu1 %v3777_v5  ;;  %v2100_v5 = vld [vmem:[#allocation7 + $0x60] sm:$0xff] }
 0x692   :  { %3075 = vmatpush1.bf16.msra.mxu1 %v3779_v19  ;;  %v3026_v19 = vpack.c.bf16 %v2100_v5, %v2096_v50 }
 0x693   :  { %3077 = vmatprep.subr.bf16.mxu1 %v3782_v38  ;;  %v2105_v38 = vld [vmem:[#allocation7 + $0x88] sm:$0xff] }
 0x694   :  { %3027 = vmatpush1.bf16.msra.mxu0 %v3026_v19 }
 0x696   :  { %3079 = vmatpush1.bf16.msra.mxu1 %v3785_v18  ;;  %v2109_v18 = vld [vmem:[#allocation7 + $0xa8] sm:$0xff] }
 0x697   :  { %3081 = vmatprep.subr.bf16.mxu1 %v3788_v31  ;;  %v3028_v31 = vpack.c.bf16 %v2109_v18, %v2105_v38 }
 0x699   :  { %3029 = vmatprep.subr.bf16.mxu0 %v3028_v31 }
 0x69a   :  { %3083 = vmatpush1.bf16.msra.mxu1 %v3791_v16  ;;  %v2104_v16 = vld [vmem:[#allocation7 + $0x80] sm:$0xff] }
 0x69b   :  { %v3030_v8 = vpack.c.bf16 %v2108_v4, %v2104_v16 }
 0x69d   :  { %3031 = vmatpush1.bf16.msra.mxu0 %v3030_v8 }
 0x69e   :  { %3033 = vmatprep.subr.bf16.mxu0 %v3032_v34  ;;  %v3084_v34 = vpack.c.bf16 %v2354_v27, %v2353_v21 }
 0x6a1   :  { %3035 = vmatpush1.bf16.msra.mxu0 %v3034_v63  ;;  %v2357_v63 = vld [vmem:[#allocation8 + $0x20] sm:$0xff] }
 0x6a2   :  { %3037 = vmatprep.subr.bf16.mxu0 %v3036_v22  ;;  %v3092_v58 = vpack.c.bf16 %v2358_v53, %v2357_v63  ;;  %v2359_v22 = vld [vmem:[#allocation8 + $0x30] sm:$0xff] }
 0x6a3   :  { %v3096_v20 = vpack.c.bf16 %v2360_v42, %v2359_v22 }
 0x6a5   :  { %3039 = vmatpush1.bf16.msra.mxu0 %v3038_v24  ;;  %v2361_v24 = vld [vmem:[#allocation8 + $0x40] sm:$0xff] }
 0x6a6   :  { %3041 = vmatprep.subr.bf16.mxu0 %v3040_v49  ;;  %v3100_v32 = vpack.c.bf16 %v2362_v60, %v2361_v24  ;;  %v2363_v49 = vld [vmem:[#allocation8 + $0x50] sm:$0xff] }
 0x6a7   :  { %v3104_v10 = vpack.c.bf16 %v2364_v59, %v2363_v49 }
 0x6a9   :  { %3043 = vmatpush1.bf16.msra.mxu0 %v3042_v23  ;;  %v2365_v23 = vld [vmem:[#allocation8 + $0x60] sm:$0xff] }
 0x6aa   :  { %3045 = vmatprep.subr.bf16.mxu0 %v3044_v48  ;;  %v3108_v35 = vpack.c.bf16 %v2366_v26, %v2365_v23  ;;  %v2368_v48 = vld [vmem:[#allocation8 + $0x78] sm:$0xff] }
 0x6ab   :  { %v3112_v25 = vpack.c.bf16 %v2368_v48, %v2367_v45 }
 0x6ad   :  { %3047 = vmatpush1.bf16.msra.mxu0 %v3046_v54 }
 0x6ae   :  { %3049 = vmatprep.subr.bf16.mxu0 %v3048_v36 }
 0x6b1   :  { %3051 = vmatpush1.bf16.msra.mxu0 %v3050_v47 }
 0x6b2   :  { %3085 = vmatprep.subr.bf16.mxu0 %v3084_v34 }
 0x750   :  { %v1957_v61 = vpop.f32.mrb[12].mxu0  ;;  %v2028_v6 = vpop.f32.mrb[16].mxu1 }
 0x751   :  { %v2033_v9 = vadd.f32 %v1957_v61, %v3594_v28  ;;  %v1959_v12 = vpop.f32.mrb[13].mxu0  ;;  %v2030_v14 = vpop.f32.mrb[17].mxu1  ;;  %v2035_v15 = vadd.f32 %v2028_v6, %v3600_v52 }
 0x752   :  { %v2034_v17 = vadd.f32 %v1959_v12, %v3596_v33  ;;  %v2036_v57 = vadd.f32 %v2030_v14, %v3602_v56 }
 0x753   :  { %v2492_v41 = vmul.f32 -1.442695, %v2033_v9  ;;  %v2494_v0 = vmul.f32 -1.442695, %v2035_v15 }
 0x754   :  { %v2493_v43 = vmul.f32 -1.442695, %v2034_v17 }
 0x755   :  { %3222 = vpow2.f32 %v2492_v41 }
 0x756   :  { %3224 = vpow2.f32 %v2493_v43 }
 0x757   :  { %3226 = vtanh.f32 %v2036_v57 }
 0x758   :  { %3228 = vpow2.f32 %v2494_v0 }
 0x75f   :  { %v3223_v39 = vpop.eup %3222 }
 0x760   :  { %v2046_v2 = vadd.f32 1.0, %v3223_v39  ;;  %v3225_v30 = vpop.eup %3224 }
 0x761   :  { %v2047_v55 = vadd.f32 1.0, %v3225_v30  ;;  %v3227_v62 = vpop.eup %3226 }
 0x762   :  { %3230 = vrcp.f32 %v2046_v2  ;;  %v3229_v11 = vpop.eup %3228 }
 0x763   :  { %3232 = vrcp.f32 %v2047_v55  ;;  %v2048_v5 = vadd.f32 1.0, %v3229_v11 }
 0x765   :  { %3234 = vrcp.f32 %v2048_v5 }
 0x76c   :  { %v3231_v1 = vpop.eup %3230 }
 0x76d   :  { %v2057_v29 = vmul.f32 %v3231_v1, %v3227_v62  ;;  %v3233_v50 = vpop.eup %3232 }
 0x76e   :  { %v2056_v19 = vmul.f32 %v3233_v50, %v3886_v3  ;;  %v2355_v3 = vld [vmem:[#allocation8 + $0x10] sm:$0xff] }
 0x76f   :  { %v3235_v18 = vpop.eup %3234  ;;  %v3088_v46 = vpack.c.bf16 %v2356_v37, %v2355_v3 }
 0x770   :  { %v3912_v38 = vadd.f32 %v2057_v29, %v2056_v19  ;;  %v2502_v19 = vld [vmem:[%s3936_s5] ss:$0 sm:$0xff] }
 0x772   :  { %3236 = vtanh.f32 %v3912_v38 }
 0x77c   :  { %v3237_v31 = vpop.eup %3236 }
 0x77d   :  { %v2060_v16 = vmul.f32 %v3237_v31, %v3235_v18 }
 0x77f   :  { %v2068_v4 = vrot.slane %v2060_v16, %v3609_v40  ;;  %2217 = vmatmul.mubr.f32.vlgmr.msra.gmra.mrb[14].mxu0 %v2060_v16  ;;  %2288 = vmatmul.mubr.f32.vlgmr.msra.gmra.mrb[18].mxu1 %v2060_v16 }
 0x780   :  { %3087 = vmatpush3.bf16.msra.mxu0 %v3084_v34 }
 0x781   :  { %v2069_v8 = vcombine.high %v2068_v4, %v2068_v4  ;;  %2495 = vst.sshfl [vmem:[#allocation2 + $0x6] sm:$0x1 pattern:$0x73625140] %v2068_v4  ;;  %3089 = vmatprep.subr.bf16.mxu0 %v3088_v46 }
 0x783   :  { %2496 = vst.sshfl [vmem:[#allocation2 + $0xe] sm:$0x1 pattern:$0x73625140] %v2069_v8 }
 0x784   :  { %3091 = vmatpush3.bf16.msra.mxu0 %v3088_v46 }
 0x785   :  { %3093 = vmatprep.subr.bf16.mxu0 %v3092_v58 }
 0x788   :  { %3095 = vmatpush3.bf16.msra.mxu0 %v3092_v58 }
 0x789   :  { %3097 = vmatprep.subr.bf16.mxu0 %v3096_v20 }
 0x78c   :  { %3099 = vmatpush3.bf16.msra.mxu0 %v3096_v20 }
 0x78d   :  { %3101 = vmatprep.subr.bf16.mxu0 %v3100_v32 }
 0x790   :  { %3103 = vmatpush3.bf16.msra.mxu0 %v3100_v32 }
 0x791   :  { %3105 = vmatprep.subr.bf16.mxu0 %v3104_v10 }
 0x794   :  { %3107 = vmatpush3.bf16.msra.mxu0 %v3104_v10 }
 0x795   :  { %3109 = vmatprep.subr.bf16.mxu0 %v3108_v35 }
 0x798   :  { %3111 = vmatpush3.bf16.msra.mxu0 %v3108_v35 }
 0x799   :  { %3113 = vmatprep.subr.bf16.mxu0 %v3112_v25 }
 0x79c   :  { %3115 = vmatpush3.bf16.msra.mxu0 %v3112_v25 }
 0x852   :  { %v2218_v44 = vpop.f32.mrb[14].mxu0  ;;  %v2289_v7 = vpop.f32.mrb[18].mxu1 }
 0x853   :  { %v2294_v54 = vadd.f32 %v2218_v44, %v3594_v28  ;;  %v2220_v36 = vpop.f32.mrb[15].mxu0  ;;  %v2291_v51 = vpop.f32.mrb[19].mxu1  ;;  %v2296_v6 = vadd.f32 %v2289_v7, %v3600_v52 }
 0x854   :  { %v2295_v13 = vadd.f32 %v2220_v36, %v3596_v33  ;;  %v2297_v9 = vadd.f32 %v2291_v51, %v3602_v56 }
 0x855   :  { %v2497_v47 = vmul.f32 -1.442695, %v2294_v54  ;;  %v2499_v12 = vmul.f32 -1.442695, %v2296_v6 }
 0x856   :  { %v2498_v61 = vmul.f32 -1.442695, %v2295_v13 }
 0x857   :  { %3238 = vpow2.f32 %v2497_v47 }
 0x858   :  { %3240 = vpow2.f32 %v2498_v61 }
 0x859   :  { %3242 = vtanh.f32 %v2297_v9 }
 0x85a   :  { %3244 = vpow2.f32 %v2499_v12 }
 0x861   :  { %v3239_v14 = vpop.eup %3238 }
 0x862   :  { %v2307_v17 = vadd.f32 1.0, %v3239_v14  ;;  %v3241_v41 = vpop.eup %3240 }
 0x863   :  { %v2308_v28 = vadd.f32 1.0, %v3241_v41  ;;  %v3243_v43 = vpop.eup %3242 }
 0x864   :  { %3246 = vrcp.f32 %v2307_v17  ;;  %v3245_v15 = vpop.eup %3244 }
 0x865   :  { %3248 = vrcp.f32 %v2308_v28  ;;  %v2309_v39 = vadd.f32 1.0, %v3245_v15 }
 0x867   :  { %3250 = vrcp.f32 %v2309_v39 }
 0x86e   :  { %v3247_v33 = vpop.eup %3246 }
 0x86f   :  { %v2318_v57 = vmul.f32 %v3247_v33, %v3243_v43  ;;  %v3249_v0 = vpop.eup %3248 }
 0x870   :  { %v2317_v2 = vmul.f32 %v3249_v0, %v3912_v38 }
 0x871   :  { %v3251_v56 = vpop.eup %3250 }
 0x872   :  { %v2319_v52 = vadd.f32 %v2318_v57, %v2317_v2 }
 0x874   :  { %3252 = vtanh.f32 %v2319_v52 }
 0x87e   :  { %v3253_v30 = vpop.eup %3252 }
 0x87f   :  { %v2321_v55 = vmul.f32 %v3253_v30, %v3251_v56 }
 0x881   :  { %v2329_v62 = vrot.slane %v2321_v55, %v3609_v40 }
 0x883   :  { %v2330_v11 = vcombine.high %v2329_v62, %v2329_v62  ;;  %2500 = vst.sshfl [vmem:[#allocation2 + $0x7] sm:$0x1 pattern:$0x73625140] %v2329_v62 }
 0x885   :  { %2501 = vst.sshfl [vmem:[#allocation2 + $0xf] sm:$0x1 pattern:$0x73625140] %v2330_v11 }
 0x88a   :  { %v2349_v1 = vld [vmem:[#allocation2] sm:$0xff] }
 0x88b   :  { %v2351_v29 = vmax.f32 %v2349_v1, 0.0 }
 0x88c   :  { %v2350_v50 = vld [vmem:[#allocation2 + $0x8] sm:$0xff] }
 0x88d   :  { %2553 = vmatprep.mubr.f32.mxu0 %v2351_v29  ;;  %v2352_v5 = vmax.f32 %v2350_v50, 0.0 }
 0x88f   :  { %2554 = vmatmul.mubr.f32.vlgmr.msra.gmra.mrb[16].mxu0 %v2352_v5 }
 0x962   :  { %v2555_v38 = vpop.f32.mrb[16].mxu0 }
 0x963   :  { %v2448_v18 = vadd.f32 %v2555_v38, %v2502_v19  ;;  %v2442_v31 = vpop.f32.mrb[17].mxu0 }
 0x964   :  { %v2443_v16 = vadd.f32 %v2502_v19, %v2442_v31 }
 0x965   :  { %2452 = vst [vmem:[%s3937_s6 + $0x8] sm:$0xff] %v2448_v18 }
 0x966   :  { %2451 = vst [vmem:[%s3937_s6] sm:$0xff] %v2443_v16 }
 0x967   :  { %2457 = vsyncpa [#allocation4], 1 }
 0x968   :  { %2458 = vsyncpa [#allocation6], 1 }
 0x969   :  { %2459 = vsyncpa [#allocation9], 1 }

</bundles_post_ra>
